<compile_context>
chip_gen: v7x
topology: tpu7x:2x2x1
jax: 0.10.0
libtpu: 0.0.40
codegen_flags: <defaults>
</compile_context>

<pallas_src>
import jax
import jax.numpy as jnp
from jax import lax
from jax.experimental import pallas as pl
from jax.experimental.pallas import tpu as pltpu

# ----------------------------- model config ---------------------------------
N_VOCAB = 28
HIDDEN = 32          # small hidden_dim for the demo (module default is 64 / 2*64)
NUM_LAYERS = 2
PAD_IDX = 0
BATCH = 2
SEQ = 8


# ------------------------------- kernel -------------------------------------
def decoder_kernel(x_ref,                          # (T*B, H)  embedded inputs, time-major rows
                   wih0_ref, whh0_ref, b0_ref,     # (H, 4H), (H, 4H), (1, 4H)
                   wih1_ref, whh1_ref, b1_ref,     # (H, 4H), (H, 4H), (1, 4H)
                   lmw_ref, lmb_ref,               # (H, VP), (1, VP)   (128-lane padded)
                   h0_ref, c0_ref,                 # (L, B, H) each
                   logits_ref,                     # (T*BP, VP)        out (time-major tiles)
                   hn_ref, cn_ref,                 # (L, B, H)         out
                   xg0_ref,                        # (T*B, 4H) f32     scratch (x@wih0 + b0)
                   h1s_ref):                       # (T*BP, H) f32     scratch (h1 stash)
    TB, H = x_ref.shape
    L, B, _ = h0_ref.shape
    T = TB // B
    BP = h1s_ref.shape[0] // T          # sublane rows reserved per time step (>= 8)
    H4 = 4 * H
    f32 = jnp.float32

    def DOT(a, b):
        return jnp.dot(a, b, precision=lax.Precision.DEFAULT,
                       preferred_element_type=f32)

    # Zero the h1 stash once: the pad rows feed the bulk lm_head and are
    # dropped in the wrapper, so they just need to be finite.
    h1s_ref[...] = jnp.zeros_like(h1s_ref)

    # ------------- loop-invariant precompute (hoisted out of the recurrence) --
    # Layer-0 input path for all steps in one matmul (b0 folded in).
    xg0_ref[...] = DOT(x_ref[...], wih0_ref[...]) + b0_ref[...]          # (TB, 4H)

    whh0 = whh0_ref[...]
    wih1 = wih1_ref[...]
    whh1 = whh1_ref[...]
    # Shared-LHS fused weight: h0_prev @ [whh0 | wih1] -> (B, 8H) in one issue.
    w0w = jnp.concatenate([whh0, wih1], axis=1)                          # (H, 8H)
    b1b = jnp.broadcast_to(b1_ref[...], (B, H4))                         # hoisted bcast

    # Gate-lane constants for the single-sigmoid activation:
    # i,f,o lanes -> sigmoid(x);  g lanes -> tanh(x) = 2*sigmoid(2x) - 1.
    lane = jax.lax.broadcasted_iota(jnp.int32, (B, H4), 1)
    g_mask = (lane >= 2 * H) & (lane < 3 * H)
    gscale = jnp.where(g_mask, 2.0, 1.0).astype(f32)
    goffs = jnp.where(g_mask, -1.0, 0.0).astype(f32)

    def activate(gates):
        s = jax.nn.sigmoid(gates * gscale)       # one EUP pass over the full vreg
        return s * gscale + goffs                # fix up the g lanes on the VPU

    def update(act, c_prev):
        # PyTorch gate ordering along lanes: [i | f | g | o]
        i = act[:, 0 * H:1 * H]
        f = act[:, 1 * H:2 * H]
        g = act[:, 2 * H:3 * H]
        o = act[:, 3 * H:4 * H]
        c_new = f * c_prev + i * g
        h_new = o * jnp.tanh(c_new)
        return h_new, c_new

    # ---- wave 0 (peeled): layer-0 step 0 only --------------------------------
    gates0 = DOT(h0_ref[0], whh0) + xg0_ref[pl.ds(0, B), :]
    h0c, c0c = update(activate(gates0), c0_ref[0])
    carry0 = (h0c, c0c, h0_ref[1], c0_ref[1])

    # ---- waves 1..T-1: layer-0 step w and layer-1 step w-1 (independent) -----
    def wave(w, carry):
        h0p, c0p, h1p, c1p = carry
        d0 = DOT(h0p, w0w)                        # (B, 8H): [h0p@whh0 | h0p@wih1]
        d1 = DOT(h1p, whh1)                       # (B, 4H), independent of d0
        gates0 = d0[:, :H4] + xg0_ref[pl.ds(w * B, B), :]
        gates1 = d0[:, H4:] + d1 + b1b
        h0n, c0n = update(activate(gates0), c0p)  # layer-0 step w
        h1n, c1n = update(activate(gates1), c1p)  # layer-1 step w-1 (no dep on h0n)
        row = pl.multiple_of((w - 1) * BP, BP)    # each step owns its own (8, .) tile
        h1s_ref[pl.ds(row, B), :] = h1n
        return (h0n, c0n, h1n, c1n)

    h0f, c0f, h1m, c1m = jax.lax.fori_loop(1, T, wave, carry0, unroll=True)

    # ---- wave T (peeled): layer-1 step T-1 only -------------------------------
    gates1 = DOT(h0f, wih1) + DOT(h1m, whh1) + b1b
    h1f, c1f = update(activate(gates1), c1m)
    h1s_ref[pl.ds((T - 1) * BP, B), :] = h1f

    hn_ref[0] = h0f
    hn_ref[1] = h1f
    cn_ref[0] = c0f
    cn_ref[1] = c1f

    # ---- deferred lm_head: one bulk matmul + lane-dense 128-wide store --------
    logits_ref[...] = DOT(h1s_ref[...], lmw_ref[...]) + lmb_ref[...]


# ------------------------------- wrapper -------------------------------------
def decoder_standard(input_seq, hidden_state, params):
    """input_seq: (B, T) int32; hidden_state: ((L,B,H), (L,B,H))."""
    (emb, wih0, whh0, b0, wih1, whh1, b1, lmw, lmb) = params
    h0, c0 = hidden_state
    B, T = input_seq.shape
    V, H = emb.shape
    L = h0.shape[0]
    BP = max(8, ((B + 7) // 8) * 8)       # stash rows per time step (own sublane tile)
    VP = ((V + 127) // 128) * 128         # lane-dense padded vocab width

    # time-major rows (row = t*B + b); the embedding gather stays in XLA.
    ids_tm = input_seq.T.reshape(T * B).astype(jnp.int32)
    x = jnp.take(emb, ids_tm, axis=0)                                    # (T*B, H)

    lmw_p = jnp.zeros((H, VP), jnp.float32).at[:, :V].set(lmw)
    lmb_p = jnp.zeros((1, VP), jnp.float32).at[:, :V].set(lmb)

    vmem = pl.BlockSpec(memory_space=pltpu.MemorySpace.VMEM)
    out_shapes = (
        jax.ShapeDtypeStruct((T * BP, VP), jnp.float32),   # padded logits (time-major tiles)
        jax.ShapeDtypeStruct((L, B, H), jnp.float32),      # h_n
        jax.ShapeDtypeStruct((L, B, H), jnp.float32),      # c_n
    )
    logits_pad, hn, cn = pl.pallas_call(
        decoder_kernel,
        out_shape=out_shapes,
        in_specs=[vmem] * 11,
        out_specs=(vmem, vmem, vmem),
        scratch_shapes=[pltpu.VMEM((T * B, 4 * H), jnp.float32),   # layer-0 input gates
                        pltpu.VMEM((T * BP, H), jnp.float32)],     # per-step h1 stash
    )(x, wih0, whh0, b0, wih1, whh1, b1, lmw_p, lmb_p, h0, c0)

    logits = jnp.transpose(logits_pad.reshape(T, BP, VP)[:, :B, :V], (1, 0, 2))  # (B,T,V)
    return logits, (hn, cn)


# --------------------------- pure-JAX reference -------------------------------
def decoder_reference(input_seq, hidden_state, params):
    (emb, wih0, whh0, b0, wih1, whh1, b1, lmw, lmb) = params
    h0, c0 = hidden_state
    H = emb.shape[1]

    def cell(x, h, c, wih, whh, b):
        g = x @ wih + h @ whh + b
        i = jax.nn.sigmoid(g[:, 0 * H:1 * H])
        f = jax.nn.sigmoid(g[:, 1 * H:2 * H])
        gg = jnp.tanh(g[:, 2 * H:3 * H])
        o = jax.nn.sigmoid(g[:, 3 * H:4 * H])
        c = f * c + i * gg
        return o * jnp.tanh(c), c

    def step(carry, ids_t):
        h0_, c0_, h1_, c1_ = carry
        x = emb[ids_t]                                     # (B, H)
        h0_, c0_ = cell(x, h0_, c0_, wih0, whh0, b0)
        h1_, c1_ = cell(h0_, h1_, c1_, wih1, whh1, b1)
        logits = h1_ @ lmw + lmb
        return (h0_, c0_, h1_, c1_), logits

    carry, logits_tm = jax.lax.scan(
        step, (h0[0], c0[0], h0[1], c0[1]), input_seq.T)
    hn = jnp.stack([carry[0], carry[2]])
    cn = jnp.stack([carry[1], carry[3]])
    return jnp.transpose(logits_tm, (1, 0, 2)), (hn, cn)


# -------------------------------- params --------------------------------------
def init_params(key, n_vocab, hidden):
    ks = jax.random.split(key, 9)
    s = 1.0 / jnp.sqrt(hidden)
    emb = jax.random.normal(ks[0], (n_vocab, hidden), jnp.float32) * 0.1
    emb = emb.at[PAD_IDX].set(0.0)                         # padding_idx=0
    def u(k, shape):
        return jax.random.uniform(k, shape, jnp.float32, -s, s)
    wih0 = u(ks[1], (hidden, 4 * hidden))                  # stored transposed
    whh0 = u(ks[2], (hidden, 4 * hidden))
    b0 = u(ks[3], (1, 4 * hidden)) + u(ks[4], (1, 4 * hidden))   # b_ih + b_hh
    wih1 = u(ks[5], (hidden, 4 * hidden))
    whh1 = u(ks[6], (hidden, 4 * hidden))
    b1 = u(ks[7], (1, 4 * hidden)) * 2.0
    lmw = jax.random.normal(ks[8], (hidden, n_vocab), jnp.float32) * 0.1
    lmb = jnp.zeros((1, n_vocab), jnp.float32)
    return (emb, wih0, whh0, b0, wih1, whh1, b1, lmw, lmb)


# --------------------------------- main ----------------------------------------
if __name__ == "__main__":
    key = jax.random.PRNGKey(0)
    k_ids, k_h, k_c, k_p = jax.random.split(key, 4)

    input_seq = jax.random.randint(k_ids, (BATCH, SEQ), 0, N_VOCAB, jnp.int32)
    h0 = jax.random.normal(k_h, (NUM_LAYERS, BATCH, HIDDEN), jnp.float32) * 0.1
    c0 = jax.random.normal(k_c, (NUM_LAYERS, BATCH, HIDDEN), jnp.float32) * 0.1
    params = init_params(k_p, N_VOCAB, HIDDEN)

    (logits, (hn, cn)) = decoder_standard(input_seq, (h0, c0), params)
    jax.block_until_ready((logits, hn, cn))

    (logits_ref, (hn_ref, cn_ref)) = decoder_reference(input_seq, (h0, c0), params)
    assert logits.shape == (BATCH, SEQ, N_VOCAB)
    assert hn.shape == (NUM_LAYERS, BATCH, HIDDEN)
    assert cn.shape == (NUM_LAYERS, BATCH, HIDDEN)
    # tolerance slightly relaxed from 1e-5: the tanh(x)=2*sigmoid(2x)-1 gate
    # rewrite and MXU default-precision matmuls introduce tiny benign deltas.
    assert jnp.allclose(logits, logits_ref, atol=2e-4, rtol=2e-4)
    assert jnp.allclose(hn, hn_ref, atol=2e-4, rtol=2e-4)
    assert jnp.allclose(cn, cn_ref, atol=2e-4, rtol=2e-4)

    print("KERNEL_OK")
</pallas_src>

<mosaic_0001>
module attributes {stable_mosaic.version = 11 : i64} {
  func.func @decoder_kernel(%arg0: memref<16x32xf32, #tpu.memory_space<vmem>>, %arg1: memref<32x128xf32, #tpu.memory_space<vmem>>, %arg2: memref<32x128xf32, #tpu.memory_space<vmem>>, %arg3: memref<1x128xf32, #tpu.memory_space<vmem>>, %arg4: memref<32x128xf32, #tpu.memory_space<vmem>>, %arg5: memref<32x128xf32, #tpu.memory_space<vmem>>, %arg6: memref<1x128xf32, #tpu.memory_space<vmem>>, %arg7: memref<32x128xf32, #tpu.memory_space<vmem>>, %arg8: memref<1x128xf32, #tpu.memory_space<vmem>>, %arg9: memref<2x2x32xf32, #tpu.memory_space<vmem>>, %arg10: memref<2x2x32xf32, #tpu.memory_space<vmem>>, %arg11: memref<64x128xf32, #tpu.memory_space<vmem>>, %arg12: memref<2x2x32xf32, #tpu.memory_space<vmem>>, %arg13: memref<2x2x32xf32, #tpu.memory_space<vmem>>, %arg14: memref<16x128xf32, #tpu.memory_space<vmem>>, %arg15: memref<64x32xf32, #tpu.memory_space<vmem>>) attributes {dimension_semantics = [], scalar_prefetch = 0 : i64, scratch_operands = 2 : i64, tpu.core_type = #tpu.core_type<tc>} {
    %cst = arith.constant 0.000000e+00 : f32
    %0 = vector.broadcast %cst : f32 to vector<64x32xf32>
    %c0 = arith.constant 0 : index
    %c0_0 = arith.constant 0 : index
    %1 = vector.load %arg15[%c0, %c0_0] : memref<64x32xf32, #tpu.memory_space<vmem>>, vector<64x32xf32>
    tpu.vector_store %arg15[%c0, %c0_0], %0 {strides = array<i32>} : memref<64x32xf32, #tpu.memory_space<vmem>>, vector<64x32xf32>,
    %c0_1 = arith.constant 0 : index
    %c0_2 = arith.constant 0 : index
    %2 = vector.load %arg0[%c0_1, %c0_2] : memref<16x32xf32, #tpu.memory_space<vmem>>, vector<16x32xf32>
    %c0_3 = arith.constant 0 : index
    %c0_4 = arith.constant 0 : index
    %3 = vector.load %arg1[%c0_3, %c0_4] : memref<32x128xf32, #tpu.memory_space<vmem>>, vector<32x128xf32>
    %cst_5 = arith.constant dense<0.000000e+00> : vector<16x128xf32>
    %4 = tpu.matmul %2, %3, %cst_5 {dimension_numbers = #tpu.dot_dimension_numbers<[1], [0], [0], [1], [0, 0, 1, 1], [], []>} : vector<16x32xf32>, vector<32x128xf32>, vector<16x128xf32> -> vector<16x128xf32>
    %c0_6 = arith.constant 0 : index
    %c0_7 = arith.constant 0 : index
    %5 = vector.load %arg3[%c0_6, %c0_7] : memref<1x128xf32, #tpu.memory_space<vmem>>, vector<1x128xf32>
    %6 = vector.broadcast %5 : vector<1x128xf32> to vector<16x128xf32>
    %7 = arith.addf %4, %6 : vector<16x128xf32>
    %c0_8 = arith.constant 0 : index
    %c0_9 = arith.constant 0 : index
    %8 = vector.load %arg14[%c0_8, %c0_9] : memref<16x128xf32, #tpu.memory_space<vmem>>, vector<16x128xf32>
    tpu.vector_store %arg14[%c0_8, %c0_9], %7 {strides = array<i32>} : memref<16x128xf32, #tpu.memory_space<vmem>>, vector<16x128xf32>,
    %c0_10 = arith.constant 0 : index
    %c0_11 = arith.constant 0 : index
    %9 = vector.load %arg2[%c0_10, %c0_11] : memref<32x128xf32, #tpu.memory_space<vmem>>, vector<32x128xf32>
    %c0_12 = arith.constant 0 : index
    %c0_13 = arith.constant 0 : index
    %10 = vector.load %arg4[%c0_12, %c0_13] : memref<32x128xf32, #tpu.memory_space<vmem>>, vector<32x128xf32>
    %c0_14 = arith.constant 0 : index
    %c0_15 = arith.constant 0 : index
    %11 = vector.load %arg5[%c0_14, %c0_15] : memref<32x128xf32, #tpu.memory_space<vmem>>, vector<32x128xf32>
    %12 = tpu.concatenate %9, %10 in 1 : vector<32x128xf32>, vector<32x128xf32> -> vector<32x256xf32>
    %c0_16 = arith.constant 0 : index
    %c0_17 = arith.constant 0 : index
    %13 = vector.load %arg6[%c0_16, %c0_17] : memref<1x128xf32, #tpu.memory_space<vmem>>, vector<1x128xf32>
    %14 = vector.shape_cast %13 : vector<1x128xf32> to vector<1x128xf32>
    %15 = vector.broadcast %14 : vector<1x128xf32> to vector<2x128xf32>
    %16 = tpu.iota {dimensions = array<i32: 1>} : vector<2x128xi32>
    %c64_i32 = arith.constant 64 : i32
    %17 = vector.broadcast %c64_i32 : i32 to vector<2x128xi32>
    %18 = arith.cmpi sge, %16, %17 : vector<2x128xi32>
    %c96_i32 = arith.constant 96 : i32
    %19 = vector.broadcast %c96_i32 : i32 to vector<2x128xi32>
    %20 = arith.cmpi slt, %16, %19 : vector<2x128xi32>
    %21 = arith.andi %18, %20 : vector<2x128xi1>
    %cst_18 = arith.constant 2.000000e+00 : f32
    %cst_19 = arith.constant 1.000000e+00 : f32
    %22 = vector.broadcast %cst_18 : f32 to vector<2x128xf32>
    %23 = vector.broadcast %cst_19 : f32 to vector<2x128xf32>
    %24 = arith.select %21, %22, %23 : vector<2x128xi1>, vector<2x128xf32>
    %cst_20 = arith.constant -1.000000e+00 : f32
    %cst_21 = arith.constant 0.000000e+00 : f32
    %25 = vector.broadcast %cst_20 : f32 to vector<2x128xf32>
    %26 = vector.broadcast %cst_21 : f32 to vector<2x128xf32>
    %27 = arith.select %21, %25, %26 : vector<2x128xi1>, vector<2x128xf32>
    %c0_22 = arith.constant 0 : index
    %c0_23 = arith.constant 0 : index
    %c0_24 = arith.constant 0 : index
    %28 = vector.load %arg9[%c0_22, %c0_23, %c0_24] : memref<2x2x32xf32, #tpu.memory_space<vmem>>, vector<1x2x32xf32>
    %29 = vector.shape_cast %28 : vector<1x2x32xf32> to vector<2x32xf32>
    %cst_25 = arith.constant dense<0.000000e+00> : vector<2x128xf32>
    %30 = tpu.matmul %29, %9, %cst_25 {dimension_numbers = #tpu.dot_dimension_numbers<[1], [0], [0], [1], [0, 0, 1, 1], [], []>} : vector<2x32xf32>, vector<32x128xf32>, vector<2x128xf32> -> vector<2x128xf32>
    %c0_26 = arith.constant 0 : index
    %c0_27 = arith.constant 0 : index
    %31 = vector.load %arg14[%c0_26, %c0_27] : memref<16x128xf32, #tpu.memory_space<vmem>>, vector<2x128xf32>
    %32 = arith.addf %30, %31 : vector<2x128xf32>
    %33 = arith.mulf %32, %24 : vector<2x128xf32>
    %34 = arith.negf %33 : vector<2x128xf32>
    %35 = math.exp %34 : vector<2x128xf32>
    %cst_28 = arith.constant 1.000000e+00 : f32
    %36 = vector.broadcast %cst_28 : f32 to vector<2x128xf32>
    %37 = arith.addf %36, %35 : vector<2x128xf32>
    %38 = arith.divf %36, %37 : vector<2x128xf32>
    %39 = arith.mulf %38, %24 : vector<2x128xf32>
    %40 = arith.addf %39, %27 : vector<2x128xf32>
    %c0_29 = arith.constant 0 : index
    %c0_30 = arith.constant 0 : index
    %c0_31 = arith.constant 0 : index
    %41 = vector.load %arg10[%c0_29, %c0_30, %c0_31] : memref<2x2x32xf32, #tpu.memory_space<vmem>>, vector<1x2x32xf32>
    %42 = vector.shape_cast %41 : vector<1x2x32xf32> to vector<2x32xf32>
    %43 = vector.extract_strided_slice %40 {offsets = [0, 0], sizes = [2, 32], strides = [1, 1]} : vector<2x128xf32> to vector<2x32xf32>
    %44 = vector.extract_strided_slice %40 {offsets = [0, 32], sizes = [2, 32], strides = [1, 1]} : vector<2x128xf32> to vector<2x32xf32>
    %45 = vector.extract_strided_slice %40 {offsets = [0, 64], sizes = [2, 32], strides = [1, 1]} : vector<2x128xf32> to vector<2x32xf32>
    %46 = vector.extract_strided_slice %40 {offsets = [0, 96], sizes = [2, 32], strides = [1, 1]} : vector<2x128xf32> to vector<2x32xf32>
    %47 = arith.mulf %44, %42 : vector<2x32xf32>
    %48 = arith.mulf %43, %45 : vector<2x32xf32>
    %49 = arith.addf %47, %48 : vector<2x32xf32>
    %50 = math.tanh %49 : vector<2x32xf32>
    %51 = arith.mulf %46, %50 : vector<2x32xf32>
    %c1 = arith.constant 1 : index
    %c0_32 = arith.constant 0 : index
    %c0_33 = arith.constant 0 : index
    %52 = vector.load %arg9[%c1, %c0_32, %c0_33] : memref<2x2x32xf32, #tpu.memory_space<vmem>>, vector<1x2x32xf32>
    %53 = vector.shape_cast %52 : vector<1x2x32xf32> to vector<2x32xf32>
    %c1_34 = arith.constant 1 : index
    %c0_35 = arith.constant 0 : index
    %c0_36 = arith.constant 0 : index
    %54 = vector.load %arg10[%c1_34, %c0_35, %c0_36] : memref<2x2x32xf32, #tpu.memory_space<vmem>>, vector<1x2x32xf32>
    %55 = vector.shape_cast %54 : vector<1x2x32xf32> to vector<2x32xf32>
    %c1_i32 = arith.constant 1 : i32
    %cst_37 = arith.constant dense<0.000000e+00> : vector<2x256xf32>
    %56 = tpu.matmul %51, %12, %cst_37 {dimension_numbers = #tpu.dot_dimension_numbers<[1], [0], [0], [1], [0, 0, 1, 1], [], []>} : vector<2x32xf32>, vector<32x256xf32>, vector<2x256xf32> -> vector<2x256xf32>
    %cst_38 = arith.constant dense<0.000000e+00> : vector<2x128xf32>
    %57 = tpu.matmul %53, %11, %cst_38 {dimension_numbers = #tpu.dot_dimension_numbers<[1], [0], [0], [1], [0, 0, 1, 1], [], []>} : vector<2x32xf32>, vector<32x128xf32>, vector<2x128xf32> -> vector<2x128xf32>
    %58 = vector.extract_strided_slice %56 {offsets = [0, 0], sizes = [2, 128], strides = [1, 1]} : vector<2x256xf32> to vector<2x128xf32>
    %c2_i32 = arith.constant 2 : i32
    %59 = arith.muli %c1_i32, %c2_i32 : i32
    %60 = arith.index_cast %59 : i32 to index
    %c0_39 = arith.constant 0 : index
    %61 = vector.load %arg14[%60, %c0_39] : memref<16x128xf32, #tpu.memory_space<vmem>>, vector<2x128xf32>
    %62 = arith.addf %58, %61 : vector<2x128xf32>
    %63 = vector.extract_strided_slice %56 {offsets = [0, 128], sizes = [2, 128], strides = [1, 1]} : vector<2x256xf32> to vector<2x128xf32>
    %64 = arith.addf %63, %57 : vector<2x128xf32>
    %65 = arith.addf %64, %15 : vector<2x128xf32>
    %66 = arith.mulf %62, %24 : vector<2x128xf32>
    %67 = arith.negf %66 : vector<2x128xf32>
    %68 = math.exp %67 : vector<2x128xf32>
    %cst_40 = arith.constant 1.000000e+00 : f32
    %69 = vector.broadcast %cst_40 : f32 to vector<2x128xf32>
    %70 = arith.addf %69, %68 : vector<2x128xf32>
    %71 = arith.divf %69, %70 : vector<2x128xf32>
    %72 = arith.mulf %71, %24 : vector<2x128xf32>
    %73 = arith.addf %72, %27 : vector<2x128xf32>
    %74 = vector.extract_strided_slice %73 {offsets = [0, 0], sizes = [2, 32], strides = [1, 1]} : vector<2x128xf32> to vector<2x32xf32>
    %75 = vector.extract_strided_slice %73 {offsets = [0, 32], sizes = [2, 32], strides = [1, 1]} : vector<2x128xf32> to vector<2x32xf32>
    %76 = vector.extract_strided_slice %73 {offsets = [0, 64], sizes = [2, 32], strides = [1, 1]} : vector<2x128xf32> to vector<2x32xf32>
    %77 = vector.extract_strided_slice %73 {offsets = [0, 96], sizes = [2, 32], strides = [1, 1]} : vector<2x128xf32> to vector<2x32xf32>
    %78 = arith.mulf %75, %49 : vector<2x32xf32>
    %79 = arith.mulf %74, %76 : vector<2x32xf32>
    %80 = arith.addf %78, %79 : vector<2x32xf32>
    %81 = math.tanh %80 : vector<2x32xf32>
    %82 = arith.mulf %77, %81 : vector<2x32xf32>
    %83 = arith.mulf %65, %24 : vector<2x128xf32>
    %84 = arith.negf %83 : vector<2x128xf32>
    %85 = math.exp %84 : vector<2x128xf32>
    %cst_41 = arith.constant 1.000000e+00 : f32
    %86 = vector.broadcast %cst_41 : f32 to vector<2x128xf32>
    %87 = arith.addf %86, %85 : vector<2x128xf32>
    %88 = arith.divf %86, %87 : vector<2x128xf32>
    %89 = arith.mulf %88, %24 : vector<2x128xf32>
    %90 = arith.addf %89, %27 : vector<2x128xf32>
    %91 = vector.extract_strided_slice %90 {offsets = [0, 0], sizes = [2, 32], strides = [1, 1]} : vector<2x128xf32> to vector<2x32xf32>
    %92 = vector.extract_strided_slice %90 {offsets = [0, 32], sizes = [2, 32], strides = [1, 1]} : vector<2x128xf32> to vector<2x32xf32>
    %93 = vector.extract_strided_slice %90 {offsets = [0, 64], sizes = [2, 32], strides = [1, 1]} : vector<2x128xf32> to vector<2x32xf32>
    %94 = vector.extract_strided_slice %90 {offsets = [0, 96], sizes = [2, 32], strides = [1, 1]} : vector<2x128xf32> to vector<2x32xf32>
    %95 = arith.mulf %92, %55 : vector<2x32xf32>
    %96 = arith.mulf %91, %93 : vector<2x32xf32>
    %97 = arith.addf %95, %96 : vector<2x32xf32>
    %98 = math.tanh %97 : vector<2x32xf32>
    %99 = arith.mulf %94, %98 : vector<2x32xf32>
    %c1_i32_42 = arith.constant 1 : i32
    %100 = arith.subi %c1_i32, %c1_i32_42 : i32
    %c8_i32 = arith.constant 8 : i32
    %101 = arith.muli %100, %c8_i32 : i32
    %102 = tpu.assume_multiple %101, 8 : i32
    %103 = arith.index_cast %102 : i32 to index
    %c0_43 = arith.constant 0 : index
    %104 = vector.load %arg15[%103, %c0_43] : memref<64x32xf32, #tpu.memory_space<vmem>>, vector<2x32xf32>
    tpu.vector_store %arg15[%103, %c0_43], %99 {strides = array<i32>} : memref<64x32xf32, #tpu.memory_space<vmem>>, vector<2x32xf32>,
    %c2_i32_44 = arith.constant 2 : i32
    %cst_45 = arith.constant dense<0.000000e+00> : vector<2x256xf32>
    %105 = tpu.matmul %82, %12, %cst_45 {dimension_numbers = #tpu.dot_dimension_numbers<[1], [0], [0], [1], [0, 0, 1, 1], [], []>} : vector<2x32xf32>, vector<32x256xf32>, vector<2x256xf32> -> vector<2x256xf32>
    %cst_46 = arith.constant dense<0.000000e+00> : vector<2x128xf32>
    %106 = tpu.matmul %99, %11, %cst_46 {dimension_numbers = #tpu.dot_dimension_numbers<[1], [0], [0], [1], [0, 0, 1, 1], [], []>} : vector<2x32xf32>, vector<32x128xf32>, vector<2x128xf32> -> vector<2x128xf32>
    %107 = vector.extract_strided_slice %105 {offsets = [0, 0], sizes = [2, 128], strides = [1, 1]} : vector<2x256xf32> to vector<2x128xf32>
    %c2_i32_47 = arith.constant 2 : i32
    %108 = arith.muli %c2_i32_44, %c2_i32_47 : i32
    %109 = arith.index_cast %108 : i32 to index
    %c0_48 = arith.constant 0 : index
    %110 = vector.load %arg14[%109, %c0_48] : memref<16x128xf32, #tpu.memory_space<vmem>>, vector<2x128xf32>
    %111 = arith.addf %107, %110 : vector<2x128xf32>
    %112 = vector.extract_strided_slice %105 {offsets = [0, 128], sizes = [2, 128], strides = [1, 1]} : vector<2x256xf32> to vector<2x128xf32>
    %113 = arith.addf %112, %106 : vector<2x128xf32>
    %114 = arith.addf %113, %15 : vector<2x128xf32>
    %115 = arith.mulf %111, %24 : vector<2x128xf32>
    %116 = arith.negf %115 : vector<2x128xf32>
    %117 = math.exp %116 : vector<2x128xf32>
    %cst_49 = arith.constant 1.000000e+00 : f32
    %118 = vector.broadcast %cst_49 : f32 to vector<2x128xf32>
    %119 = arith.addf %118, %117 : vector<2x128xf32>
    %120 = arith.divf %118, %119 : vector<2x128xf32>
    %121 = arith.mulf %120, %24 : vector<2x128xf32>
    %122 = arith.addf %121, %27 : vector<2x128xf32>
    %123 = vector.extract_strided_slice %122 {offsets = [0, 0], sizes = [2, 32], strides = [1, 1]} : vector<2x128xf32> to vector<2x32xf32>
    %124 = vector.extract_strided_slice %122 {offsets = [0, 32], sizes = [2, 32], strides = [1, 1]} : vector<2x128xf32> to vector<2x32xf32>
    %125 = vector.extract_strided_slice %122 {offsets = [0, 64], sizes = [2, 32], strides = [1, 1]} : vector<2x128xf32> to vector<2x32xf32>
    %126 = vector.extract_strided_slice %122 {offsets = [0, 96], sizes = [2, 32], strides = [1, 1]} : vector<2x128xf32> to vector<2x32xf32>
    %127 = arith.mulf %124, %80 : vector<2x32xf32>
    %128 = arith.mulf %123, %125 : vector<2x32xf32>
    %129 = arith.addf %127, %128 : vector<2x32xf32>
    %130 = math.tanh %129 : vector<2x32xf32>
    %131 = arith.mulf %126, %130 : vector<2x32xf32>
    %132 = arith.mulf %114, %24 : vector<2x128xf32>
    %133 = arith.negf %132 : vector<2x128xf32>
    %134 = math.exp %133 : vector<2x128xf32>
    %cst_50 = arith.constant 1.000000e+00 : f32
    %135 = vector.broadcast %cst_50 : f32 to vector<2x128xf32>
    %136 = arith.addf %135, %134 : vector<2x128xf32>
    %137 = arith.divf %135, %136 : vector<2x128xf32>
    %138 = arith.mulf %137, %24 : vector<2x128xf32>
    %139 = arith.addf %138, %27 : vector<2x128xf32>
    %140 = vector.extract_strided_slice %139 {offsets = [0, 0], sizes = [2, 32], strides = [1, 1]} : vector<2x128xf32> to vector<2x32xf32>
    %141 = vector.extract_strided_slice %139 {offsets = [0, 32], sizes = [2, 32], strides = [1, 1]} : vector<2x128xf32> to vector<2x32xf32>
    %142 = vector.extract_strided_slice %139 {offsets = [0, 64], sizes = [2, 32], strides = [1, 1]} : vector<2x128xf32> to vector<2x32xf32>
    %143 = vector.extract_strided_slice %139 {offsets = [0, 96], sizes = [2, 32], strides = [1, 1]} : vector<2x128xf32> to vector<2x32xf32>
    %144 = arith.mulf %141, %97 : vector<2x32xf32>
    %145 = arith.mulf %140, %142 : vector<2x32xf32>
    %146 = arith.addf %144, %145 : vector<2x32xf32>
    %147 = math.tanh %146 : vector<2x32xf32>
    %148 = arith.mulf %143, %147 : vector<2x32xf32>
    %c1_i32_51 = arith.constant 1 : i32
    %149 = arith.subi %c2_i32_44, %c1_i32_51 : i32
    %c8_i32_52 = arith.constant 8 : i32
    %150 = arith.muli %149, %c8_i32_52 : i32
    %151 = tpu.assume_multiple %150, 8 : i32
    %152 = arith.index_cast %151 : i32 to index
    %c0_53 = arith.constant 0 : index
    %153 = vector.load %arg15[%152, %c0_53] : memref<64x32xf32, #tpu.memory_space<vmem>>, vector<2x32xf32>
    tpu.vector_store %arg15[%152, %c0_53], %148 {strides = array<i32>} : memref<64x32xf32, #tpu.memory_space<vmem>>, vector<2x32xf32>,
    %c3_i32 = arith.constant 3 : i32
    %cst_54 = arith.constant dense<0.000000e+00> : vector<2x256xf32>
    %154 = tpu.matmul %131, %12, %cst_54 {dimension_numbers = #tpu.dot_dimension_numbers<[1], [0], [0], [1], [0, 0, 1, 1], [], []>} : vector<2x32xf32>, vector<32x256xf32>, vector<2x256xf32> -> vector<2x256xf32>
    %cst_55 = arith.constant dense<0.000000e+00> : vector<2x128xf32>
    %155 = tpu.matmul %148, %11, %cst_55 {dimension_numbers = #tpu.dot_dimension_numbers<[1], [0], [0], [1], [0, 0, 1, 1], [], []>} : vector<2x32xf32>, vector<32x128xf32>, vector<2x128xf32> -> vector<2x128xf32>
    %156 = vector.extract_strided_slice %154 {offsets = [0, 0], sizes = [2, 128], strides = [1, 1]} : vector<2x256xf32> to vector<2x128xf32>
    %c2_i32_56 = arith.constant 2 : i32
    %157 = arith.muli %c3_i32, %c2_i32_56 : i32
    %158 = arith.index_cast %157 : i32 to index
    %c0_57 = arith.constant 0 : index
    %159 = vector.load %arg14[%158, %c0_57] : memref<16x128xf32, #tpu.memory_space<vmem>>, vector<2x128xf32>
    %160 = arith.addf %156, %159 : vector<2x128xf32>
    %161 = vector.extract_strided_slice %154 {offsets = [0, 128], sizes = [2, 128], strides = [1, 1]} : vector<2x256xf32> to vector<2x128xf32>
    %162 = arith.addf %161, %155 : vector<2x128xf32>
    %163 = arith.addf %162, %15 : vector<2x128xf32>
    %164 = arith.mulf %160, %24 : vector<2x128xf32>
    %165 = arith.negf %164 : vector<2x128xf32>
    %166 = math.exp %165 : vector<2x128xf32>
    %cst_58 = arith.constant 1.000000e+00 : f32
    %167 = vector.broadcast %cst_58 : f32 to vector<2x128xf32>
    %168 = arith.addf %167, %166 : vector<2x128xf32>
    %169 = arith.divf %167, %168 : vector<2x128xf32>
    %170 = arith.mulf %169, %24 : vector<2x128xf32>
    %171 = arith.addf %170, %27 : vector<2x128xf32>
    %172 = vector.extract_strided_slice %171 {offsets = [0, 0], sizes = [2, 32], strides = [1, 1]} : vector<2x128xf32> to vector<2x32xf32>
    %173 = vector.extract_strided_slice %171 {offsets = [0, 32], sizes = [2, 32], strides = [1, 1]} : vector<2x128xf32> to vector<2x32xf32>
    %174 = vector.extract_strided_slice %171 {offsets = [0, 64], sizes = [2, 32], strides = [1, 1]} : vector<2x128xf32> to vector<2x32xf32>
    %175 = vector.extract_strided_slice %171 {offsets = [0, 96], sizes = [2, 32], strides = [1, 1]} : vector<2x128xf32> to vector<2x32xf32>
    %176 = arith.mulf %173, %129 : vector<2x32xf32>
    %177 = arith.mulf %172, %174 : vector<2x32xf32>
    %178 = arith.addf %176, %177 : vector<2x32xf32>
    %179 = math.tanh %178 : vector<2x32xf32>
    %180 = arith.mulf %175, %179 : vector<2x32xf32>
    %181 = arith.mulf %163, %24 : vector<2x128xf32>
    %182 = arith.negf %181 : vector<2x128xf32>
    %183 = math.exp %182 : vector<2x128xf32>
    %cst_59 = arith.constant 1.000000e+00 : f32
    %184 = vector.broadcast %cst_59 : f32 to vector<2x128xf32>
    %185 = arith.addf %184, %183 : vector<2x128xf32>
    %186 = arith.divf %184, %185 : vector<2x128xf32>
    %187 = arith.mulf %186, %24 : vector<2x128xf32>
    %188 = arith.addf %187, %27 : vector<2x128xf32>
    %189 = vector.extract_strided_slice %188 {offsets = [0, 0], sizes = [2, 32], strides = [1, 1]} : vector<2x128xf32> to vector<2x32xf32>
    %190 = vector.extract_strided_slice %188 {offsets = [0, 32], sizes = [2, 32], strides = [1, 1]} : vector<2x128xf32> to vector<2x32xf32>
    %191 = vector.extract_strided_slice %188 {offsets = [0, 64], sizes = [2, 32], strides = [1, 1]} : vector<2x128xf32> to vector<2x32xf32>
    %192 = vector.extract_strided_slice %188 {offsets = [0, 96], sizes = [2, 32], strides = [1, 1]} : vector<2x128xf32> to vector<2x32xf32>
    %193 = arith.mulf %190, %146 : vector<2x32xf32>
    %194 = arith.mulf %189, %191 : vector<2x32xf32>
    %195 = arith.addf %193, %194 : vector<2x32xf32>
    %196 = math.tanh %195 : vector<2x32xf32>
    %197 = arith.mulf %192, %196 : vector<2x32xf32>
    %c1_i32_60 = arith.constant 1 : i32
    %198 = arith.subi %c3_i32, %c1_i32_60 : i32
    %c8_i32_61 = arith.constant 8 : i32
    %199 = arith.muli %198, %c8_i32_61 : i32
    %200 = tpu.assume_multiple %199, 8 : i32
    %201 = arith.index_cast %200 : i32 to index
    %c0_62 = arith.constant 0 : index
    %202 = vector.load %arg15[%201, %c0_62] : memref<64x32xf32, #tpu.memory_space<vmem>>, vector<2x32xf32>
    tpu.vector_store %arg15[%201, %c0_62], %197 {strides = array<i32>} : memref<64x32xf32, #tpu.memory_space<vmem>>, vector<2x32xf32>,
    %c4_i32 = arith.constant 4 : i32
    %cst_63 = arith.constant dense<0.000000e+00> : vector<2x256xf32>
    %203 = tpu.matmul %180, %12, %cst_63 {dimension_numbers = #tpu.dot_dimension_numbers<[1], [0], [0], [1], [0, 0, 1, 1], [], []>} : vector<2x32xf32>, vector<32x256xf32>, vector<2x256xf32> -> vector<2x256xf32>
    %cst_64 = arith.constant dense<0.000000e+00> : vector<2x128xf32>
    %204 = tpu.matmul %197, %11, %cst_64 {dimension_numbers = #tpu.dot_dimension_numbers<[1], [0], [0], [1], [0, 0, 1, 1], [], []>} : vector<2x32xf32>, vector<32x128xf32>, vector<2x128xf32> -> vector<2x128xf32>
    %205 = vector.extract_strided_slice %203 {offsets = [0, 0], sizes = [2, 128], strides = [1, 1]} : vector<2x256xf32> to vector<2x128xf32>
    %c2_i32_65 = arith.constant 2 : i32
    %206 = arith.muli %c4_i32, %c2_i32_65 : i32
    %207 = arith.index_cast %206 : i32 to index
    %c0_66 = arith.constant 0 : index
    %208 = vector.load %arg14[%207, %c0_66] : memref<16x128xf32, #tpu.memory_space<vmem>>, vector<2x128xf32>
    %209 = arith.addf %205, %208 : vector<2x128xf32>
    %210 = vector.extract_strided_slice %203 {offsets = [0, 128], sizes = [2, 128], strides = [1, 1]} : vector<2x256xf32> to vector<2x128xf32>
    %211 = arith.addf %210, %204 : vector<2x128xf32>
    %212 = arith.addf %211, %15 : vector<2x128xf32>
    %213 = arith.mulf %209, %24 : vector<2x128xf32>
    %214 = arith.negf %213 : vector<2x128xf32>
    %215 = math.exp %214 : vector<2x128xf32>
    %cst_67 = arith.constant 1.000000e+00 : f32
    %216 = vector.broadcast %cst_67 : f32 to vector<2x128xf32>
    %217 = arith.addf %216, %215 : vector<2x128xf32>
    %218 = arith.divf %216, %217 : vector<2x128xf32>
    %219 = arith.mulf %218, %24 : vector<2x128xf32>
    %220 = arith.addf %219, %27 : vector<2x128xf32>
    %221 = vector.extract_strided_slice %220 {offsets = [0, 0], sizes = [2, 32], strides = [1, 1]} : vector<2x128xf32> to vector<2x32xf32>
    %222 = vector.extract_strided_slice %220 {offsets = [0, 32], sizes = [2, 32], strides = [1, 1]} : vector<2x128xf32> to vector<2x32xf32>
    %223 = vector.extract_strided_slice %220 {offsets = [0, 64], sizes = [2, 32], strides = [1, 1]} : vector<2x128xf32> to vector<2x32xf32>
    %224 = vector.extract_strided_slice %220 {offsets = [0, 96], sizes = [2, 32], strides = [1, 1]} : vector<2x128xf32> to vector<2x32xf32>
    %225 = arith.mulf %222, %178 : vector<2x32xf32>
    %226 = arith.mulf %221, %223 : vector<2x32xf32>
    %227 = arith.addf %225, %226 : vector<2x32xf32>
    %228 = math.tanh %227 : vector<2x32xf32>
    %229 = arith.mulf %224, %228 : vector<2x32xf32>
    %230 = arith.mulf %212, %24 : vector<2x128xf32>
    %231 = arith.negf %230 : vector<2x128xf32>
    %232 = math.exp %231 : vector<2x128xf32>
    %cst_68 = arith.constant 1.000000e+00 : f32
    %233 = vector.broadcast %cst_68 : f32 to vector<2x128xf32>
    %234 = arith.addf %233, %232 : vector<2x128xf32>
    %235 = arith.divf %233, %234 : vector<2x128xf32>
    %236 = arith.mulf %235, %24 : vector<2x128xf32>
    %237 = arith.addf %236, %27 : vector<2x128xf32>
    %238 = vector.extract_strided_slice %237 {offsets = [0, 0], sizes = [2, 32], strides = [1, 1]} : vector<2x128xf32> to vector<2x32xf32>
    %239 = vector.extract_strided_slice %237 {offsets = [0, 32], sizes = [2, 32], strides = [1, 1]} : vector<2x128xf32> to vector<2x32xf32>
    %240 = vector.extract_strided_slice %237 {offsets = [0, 64], sizes = [2, 32], strides = [1, 1]} : vector<2x128xf32> to vector<2x32xf32>
    %241 = vector.extract_strided_slice %237 {offsets = [0, 96], sizes = [2, 32], strides = [1, 1]} : vector<2x128xf32> to vector<2x32xf32>
    %242 = arith.mulf %239, %195 : vector<2x32xf32>
    %243 = arith.mulf %238, %240 : vector<2x32xf32>
    %244 = arith.addf %242, %243 : vector<2x32xf32>
    %245 = math.tanh %244 : vector<2x32xf32>
    %246 = arith.mulf %241, %245 : vector<2x32xf32>
    %c1_i32_69 = arith.constant 1 : i32
    %247 = arith.subi %c4_i32, %c1_i32_69 : i32
    %c8_i32_70 = arith.constant 8 : i32
    %248 = arith.muli %247, %c8_i32_70 : i32
    %249 = tpu.assume_multiple %248, 8 : i32
    %250 = arith.index_cast %249 : i32 to index
    %c0_71 = arith.constant 0 : index
    %251 = vector.load %arg15[%250, %c0_71] : memref<64x32xf32, #tpu.memory_space<vmem>>, vector<2x32xf32>
    tpu.vector_store %arg15[%250, %c0_71], %246 {strides = array<i32>} : memref<64x32xf32, #tpu.memory_space<vmem>>, vector<2x32xf32>,
    %c5_i32 = arith.constant 5 : i32
    %cst_72 = arith.constant dense<0.000000e+00> : vector<2x256xf32>
    %252 = tpu.matmul %229, %12, %cst_72 {dimension_numbers = #tpu.dot_dimension_numbers<[1], [0], [0], [1], [0, 0, 1, 1], [], []>} : vector<2x32xf32>, vector<32x256xf32>, vector<2x256xf32> -> vector<2x256xf32>
    %cst_73 = arith.constant dense<0.000000e+00> : vector<2x128xf32>
    %253 = tpu.matmul %246, %11, %cst_73 {dimension_numbers = #tpu.dot_dimension_numbers<[1], [0], [0], [1], [0, 0, 1, 1], [], []>} : vector<2x32xf32>, vector<32x128xf32>, vector<2x128xf32> -> vector<2x128xf32>
    %254 = vector.extract_strided_slice %252 {offsets = [0, 0], sizes = [2, 128], strides = [1, 1]} : vector<2x256xf32> to vector<2x128xf32>
    %c2_i32_74 = arith.constant 2 : i32
    %255 = arith.muli %c5_i32, %c2_i32_74 : i32
    %256 = arith.index_cast %255 : i32 to index
    %c0_75 = arith.constant 0 : index
    %257 = vector.load %arg14[%256, %c0_75] : memref<16x128xf32, #tpu.memory_space<vmem>>, vector<2x128xf32>
    %258 = arith.addf %254, %257 : vector<2x128xf32>
    %259 = vector.extract_strided_slice %252 {offsets = [0, 128], sizes = [2, 128], strides = [1, 1]} : vector<2x256xf32> to vector<2x128xf32>
    %260 = arith.addf %259, %253 : vector<2x128xf32>
    %261 = arith.addf %260, %15 : vector<2x128xf32>
    %262 = arith.mulf %258, %24 : vector<2x128xf32>
    %263 = arith.negf %262 : vector<2x128xf32>
    %264 = math.exp %263 : vector<2x128xf32>
    %cst_76 = arith.constant 1.000000e+00 : f32
    %265 = vector.broadcast %cst_76 : f32 to vector<2x128xf32>
    %266 = arith.addf %265, %264 : vector<2x128xf32>
    %267 = arith.divf %265, %266 : vector<2x128xf32>
    %268 = arith.mulf %267, %24 : vector<2x128xf32>
    %269 = arith.addf %268, %27 : vector<2x128xf32>
    %270 = vector.extract_strided_slice %269 {offsets = [0, 0], sizes = [2, 32], strides = [1, 1]} : vector<2x128xf32> to vector<2x32xf32>
    %271 = vector.extract_strided_slice %269 {offsets = [0, 32], sizes = [2, 32], strides = [1, 1]} : vector<2x128xf32> to vector<2x32xf32>
    %272 = vector.extract_strided_slice %269 {offsets = [0, 64], sizes = [2, 32], strides = [1, 1]} : vector<2x128xf32> to vector<2x32xf32>
    %273 = vector.extract_strided_slice %269 {offsets = [0, 96], sizes = [2, 32], strides = [1, 1]} : vector<2x128xf32> to vector<2x32xf32>
    %274 = arith.mulf %271, %227 : vector<2x32xf32>
    %275 = arith.mulf %270, %272 : vector<2x32xf32>
    %276 = arith.addf %274, %275 : vector<2x32xf32>
    %277 = math.tanh %276 : vector<2x32xf32>
    %278 = arith.mulf %273, %277 : vector<2x32xf32>
    %279 = arith.mulf %261, %24 : vector<2x128xf32>
    %280 = arith.negf %279 : vector<2x128xf32>
    %281 = math.exp %280 : vector<2x128xf32>
    %cst_77 = arith.constant 1.000000e+00 : f32
    %282 = vector.broadcast %cst_77 : f32 to vector<2x128xf32>
    %283 = arith.addf %282, %281 : vector<2x128xf32>
    %284 = arith.divf %282, %283 : vector<2x128xf32>
    %285 = arith.mulf %284, %24 : vector<2x128xf32>
    %286 = arith.addf %285, %27 : vector<2x128xf32>
    %287 = vector.extract_strided_slice %286 {offsets = [0, 0], sizes = [2, 32], strides = [1, 1]} : vector<2x128xf32> to vector<2x32xf32>
    %288 = vector.extract_strided_slice %286 {offsets = [0, 32], sizes = [2, 32], strides = [1, 1]} : vector<2x128xf32> to vector<2x32xf32>
    %289 = vector.extract_strided_slice %286 {offsets = [0, 64], sizes = [2, 32], strides = [1, 1]} : vector<2x128xf32> to vector<2x32xf32>
    %290 = vector.extract_strided_slice %286 {offsets = [0, 96], sizes = [2, 32], strides = [1, 1]} : vector<2x128xf32> to vector<2x32xf32>
    %291 = arith.mulf %288, %244 : vector<2x32xf32>
    %292 = arith.mulf %287, %289 : vector<2x32xf32>
    %293 = arith.addf %291, %292 : vector<2x32xf32>
    %294 = math.tanh %293 : vector<2x32xf32>
    %295 = arith.mulf %290, %294 : vector<2x32xf32>
    %c1_i32_78 = arith.constant 1 : i32
    %296 = arith.subi %c5_i32, %c1_i32_78 : i32
    %c8_i32_79 = arith.constant 8 : i32
    %297 = arith.muli %296, %c8_i32_79 : i32
    %298 = tpu.assume_multiple %297, 8 : i32
    %299 = arith.index_cast %298 : i32 to index
    %c0_80 = arith.constant 0 : index
    %300 = vector.load %arg15[%299, %c0_80] : memref<64x32xf32, #tpu.memory_space<vmem>>, vector<2x32xf32>
    tpu.vector_store %arg15[%299, %c0_80], %295 {strides = array<i32>} : memref<64x32xf32, #tpu.memory_space<vmem>>, vector<2x32xf32>,
    %c6_i32 = arith.constant 6 : i32
    %cst_81 = arith.constant dense<0.000000e+00> : vector<2x256xf32>
    %301 = tpu.matmul %278, %12, %cst_81 {dimension_numbers = #tpu.dot_dimension_numbers<[1], [0], [0], [1], [0, 0, 1, 1], [], []>} : vector<2x32xf32>, vector<32x256xf32>, vector<2x256xf32> -> vector<2x256xf32>
    %cst_82 = arith.constant dense<0.000000e+00> : vector<2x128xf32>
    %302 = tpu.matmul %295, %11, %cst_82 {dimension_numbers = #tpu.dot_dimension_numbers<[1], [0], [0], [1], [0, 0, 1, 1], [], []>} : vector<2x32xf32>, vector<32x128xf32>, vector<2x128xf32> -> vector<2x128xf32>
    %303 = vector.extract_strided_slice %301 {offsets = [0, 0], sizes = [2, 128], strides = [1, 1]} : vector<2x256xf32> to vector<2x128xf32>
    %c2_i32_83 = arith.constant 2 : i32
    %304 = arith.muli %c6_i32, %c2_i32_83 : i32
    %305 = arith.index_cast %304 : i32 to index
    %c0_84 = arith.constant 0 : index
    %306 = vector.load %arg14[%305, %c0_84] : memref<16x128xf32, #tpu.memory_space<vmem>>, vector<2x128xf32>
    %307 = arith.addf %303, %306 : vector<2x128xf32>
    %308 = vector.extract_strided_slice %301 {offsets = [0, 128], sizes = [2, 128], strides = [1, 1]} : vector<2x256xf32> to vector<2x128xf32>
    %309 = arith.addf %308, %302 : vector<2x128xf32>
    %310 = arith.addf %309, %15 : vector<2x128xf32>
    %311 = arith.mulf %307, %24 : vector<2x128xf32>
    %312 = arith.negf %311 : vector<2x128xf32>
    %313 = math.exp %312 : vector<2x128xf32>
    %cst_85 = arith.constant 1.000000e+00 : f32
    %314 = vector.broadcast %cst_85 : f32 to vector<2x128xf32>
    %315 = arith.addf %314, %313 : vector<2x128xf32>
    %316 = arith.divf %314, %315 : vector<2x128xf32>
    %317 = arith.mulf %316, %24 : vector<2x128xf32>
    %318 = arith.addf %317, %27 : vector<2x128xf32>
    %319 = vector.extract_strided_slice %318 {offsets = [0, 0], sizes = [2, 32], strides = [1, 1]} : vector<2x128xf32> to vector<2x32xf32>
    %320 = vector.extract_strided_slice %318 {offsets = [0, 32], sizes = [2, 32], strides = [1, 1]} : vector<2x128xf32> to vector<2x32xf32>
    %321 = vector.extract_strided_slice %318 {offsets = [0, 64], sizes = [2, 32], strides = [1, 1]} : vector<2x128xf32> to vector<2x32xf32>
    %322 = vector.extract_strided_slice %318 {offsets = [0, 96], sizes = [2, 32], strides = [1, 1]} : vector<2x128xf32> to vector<2x32xf32>
    %323 = arith.mulf %320, %276 : vector<2x32xf32>
    %324 = arith.mulf %319, %321 : vector<2x32xf32>
    %325 = arith.addf %323, %324 : vector<2x32xf32>
    %326 = math.tanh %325 : vector<2x32xf32>
    %327 = arith.mulf %322, %326 : vector<2x32xf32>
    %328 = arith.mulf %310, %24 : vector<2x128xf32>
    %329 = arith.negf %328 : vector<2x128xf32>
    %330 = math.exp %329 : vector<2x128xf32>
    %cst_86 = arith.constant 1.000000e+00 : f32
    %331 = vector.broadcast %cst_86 : f32 to vector<2x128xf32>
    %332 = arith.addf %331, %330 : vector<2x128xf32>
    %333 = arith.divf %331, %332 : vector<2x128xf32>
    %334 = arith.mulf %333, %24 : vector<2x128xf32>
    %335 = arith.addf %334, %27 : vector<2x128xf32>
    %336 = vector.extract_strided_slice %335 {offsets = [0, 0], sizes = [2, 32], strides = [1, 1]} : vector<2x128xf32> to vector<2x32xf32>
    %337 = vector.extract_strided_slice %335 {offsets = [0, 32], sizes = [2, 32], strides = [1, 1]} : vector<2x128xf32> to vector<2x32xf32>
    %338 = vector.extract_strided_slice %335 {offsets = [0, 64], sizes = [2, 32], strides = [1, 1]} : vector<2x128xf32> to vector<2x32xf32>
    %339 = vector.extract_strided_slice %335 {offsets = [0, 96], sizes = [2, 32], strides = [1, 1]} : vector<2x128xf32> to vector<2x32xf32>
    %340 = arith.mulf %337, %293 : vector<2x32xf32>
    %341 = arith.mulf %336, %338 : vector<2x32xf32>
    %342 = arith.addf %340, %341 : vector<2x32xf32>
    %343 = math.tanh %342 : vector<2x32xf32>
    %344 = arith.mulf %339, %343 : vector<2x32xf32>
    %c1_i32_87 = arith.constant 1 : i32
    %345 = arith.subi %c6_i32, %c1_i32_87 : i32
    %c8_i32_88 = arith.constant 8 : i32
    %346 = arith.muli %345, %c8_i32_88 : i32
    %347 = tpu.assume_multiple %346, 8 : i32
    %348 = arith.index_cast %347 : i32 to index
    %c0_89 = arith.constant 0 : index
    %349 = vector.load %arg15[%348, %c0_89] : memref<64x32xf32, #tpu.memory_space<vmem>>, vector<2x32xf32>
    tpu.vector_store %arg15[%348, %c0_89], %344 {strides = array<i32>} : memref<64x32xf32, #tpu.memory_space<vmem>>, vector<2x32xf32>,
    %c7_i32 = arith.constant 7 : i32
    %cst_90 = arith.constant dense<0.000000e+00> : vector<2x256xf32>
    %350 = tpu.matmul %327, %12, %cst_90 {dimension_numbers = #tpu.dot_dimension_numbers<[1], [0], [0], [1], [0, 0, 1, 1], [], []>} : vector<2x32xf32>, vector<32x256xf32>, vector<2x256xf32> -> vector<2x256xf32>
    %cst_91 = arith.constant dense<0.000000e+00> : vector<2x128xf32>
    %351 = tpu.matmul %344, %11, %cst_91 {dimension_numbers = #tpu.dot_dimension_numbers<[1], [0], [0], [1], [0, 0, 1, 1], [], []>} : vector<2x32xf32>, vector<32x128xf32>, vector<2x128xf32> -> vector<2x128xf32>
    %352 = vector.extract_strided_slice %350 {offsets = [0, 0], sizes = [2, 128], strides = [1, 1]} : vector<2x256xf32> to vector<2x128xf32>
    %c2_i32_92 = arith.constant 2 : i32
    %353 = arith.muli %c7_i32, %c2_i32_92 : i32
    %354 = arith.index_cast %353 : i32 to index
    %c0_93 = arith.constant 0 : index
    %355 = vector.load %arg14[%354, %c0_93] : memref<16x128xf32, #tpu.memory_space<vmem>>, vector<2x128xf32>
    %356 = arith.addf %352, %355 : vector<2x128xf32>
    %357 = vector.extract_strided_slice %350 {offsets = [0, 128], sizes = [2, 128], strides = [1, 1]} : vector<2x256xf32> to vector<2x128xf32>
    %358 = arith.addf %357, %351 : vector<2x128xf32>
    %359 = arith.addf %358, %15 : vector<2x128xf32>
    %360 = arith.mulf %356, %24 : vector<2x128xf32>
    %361 = arith.negf %360 : vector<2x128xf32>
    %362 = math.exp %361 : vector<2x128xf32>
    %cst_94 = arith.constant 1.000000e+00 : f32
    %363 = vector.broadcast %cst_94 : f32 to vector<2x128xf32>
    %364 = arith.addf %363, %362 : vector<2x128xf32>
    %365 = arith.divf %363, %364 : vector<2x128xf32>
    %366 = arith.mulf %365, %24 : vector<2x128xf32>
    %367 = arith.addf %366, %27 : vector<2x128xf32>
    %368 = vector.extract_strided_slice %367 {offsets = [0, 0], sizes = [2, 32], strides = [1, 1]} : vector<2x128xf32> to vector<2x32xf32>
    %369 = vector.extract_strided_slice %367 {offsets = [0, 32], sizes = [2, 32], strides = [1, 1]} : vector<2x128xf32> to vector<2x32xf32>
    %370 = vector.extract_strided_slice %367 {offsets = [0, 64], sizes = [2, 32], strides = [1, 1]} : vector<2x128xf32> to vector<2x32xf32>
    %371 = vector.extract_strided_slice %367 {offsets = [0, 96], sizes = [2, 32], strides = [1, 1]} : vector<2x128xf32> to vector<2x32xf32>
    %372 = arith.mulf %369, %325 : vector<2x32xf32>
    %373 = arith.mulf %368, %370 : vector<2x32xf32>
    %374 = arith.addf %372, %373 : vector<2x32xf32>
    %375 = math.tanh %374 : vector<2x32xf32>
    %376 = arith.mulf %371, %375 : vector<2x32xf32>
    %377 = arith.mulf %359, %24 : vector<2x128xf32>
    %378 = arith.negf %377 : vector<2x128xf32>
    %379 = math.exp %378 : vector<2x128xf32>
    %cst_95 = arith.constant 1.000000e+00 : f32
    %380 = vector.broadcast %cst_95 : f32 to vector<2x128xf32>
    %381 = arith.addf %380, %379 : vector<2x128xf32>
    %382 = arith.divf %380, %381 : vector<2x128xf32>
    %383 = arith.mulf %382, %24 : vector<2x128xf32>
    %384 = arith.addf %383, %27 : vector<2x128xf32>
    %385 = vector.extract_strided_slice %384 {offsets = [0, 0], sizes = [2, 32], strides = [1, 1]} : vector<2x128xf32> to vector<2x32xf32>
    %386 = vector.extract_strided_slice %384 {offsets = [0, 32], sizes = [2, 32], strides = [1, 1]} : vector<2x128xf32> to vector<2x32xf32>
    %387 = vector.extract_strided_slice %384 {offsets = [0, 64], sizes = [2, 32], strides = [1, 1]} : vector<2x128xf32> to vector<2x32xf32>
    %388 = vector.extract_strided_slice %384 {offsets = [0, 96], sizes = [2, 32], strides = [1, 1]} : vector<2x128xf32> to vector<2x32xf32>
    %389 = arith.mulf %386, %342 : vector<2x32xf32>
    %390 = arith.mulf %385, %387 : vector<2x32xf32>
    %391 = arith.addf %389, %390 : vector<2x32xf32>
    %392 = math.tanh %391 : vector<2x32xf32>
    %393 = arith.mulf %388, %392 : vector<2x32xf32>
    %c1_i32_96 = arith.constant 1 : i32
    %394 = arith.subi %c7_i32, %c1_i32_96 : i32
    %c8_i32_97 = arith.constant 8 : i32
    %395 = arith.muli %394, %c8_i32_97 : i32
    %396 = tpu.assume_multiple %395, 8 : i32
    %397 = arith.index_cast %396 : i32 to index
    %c0_98 = arith.constant 0 : index
    %398 = vector.load %arg15[%397, %c0_98] : memref<64x32xf32, #tpu.memory_space<vmem>>, vector<2x32xf32>
    tpu.vector_store %arg15[%397, %c0_98], %393 {strides = array<i32>} : memref<64x32xf32, #tpu.memory_space<vmem>>, vector<2x32xf32>,
    %c7_i32_99 = arith.constant 7 : i32
    %cst_100 = arith.constant dense<0.000000e+00> : vector<2x128xf32>
    %399 = tpu.matmul %376, %10, %cst_100 {dimension_numbers = #tpu.dot_dimension_numbers<[1], [0], [0], [1], [0, 0, 1, 1], [], []>} : vector<2x32xf32>, vector<32x128xf32>, vector<2x128xf32> -> vector<2x128xf32>
    %cst_101 = arith.constant dense<0.000000e+00> : vector<2x128xf32>
    %400 = tpu.matmul %393, %11, %cst_101 {dimension_numbers = #tpu.dot_dimension_numbers<[1], [0], [0], [1], [0, 0, 1, 1], [], []>} : vector<2x32xf32>, vector<32x128xf32>, vector<2x128xf32> -> vector<2x128xf32>
    %401 = arith.addf %399, %400 : vector<2x128xf32>
    %402 = arith.addf %401, %15 : vector<2x128xf32>
    %403 = arith.mulf %402, %24 : vector<2x128xf32>
    %404 = arith.negf %403 : vector<2x128xf32>
    %405 = math.exp %404 : vector<2x128xf32>
    %cst_102 = arith.constant 1.000000e+00 : f32
    %406 = vector.broadcast %cst_102 : f32 to vector<2x128xf32>
    %407 = arith.addf %406, %405 : vector<2x128xf32>
    %408 = arith.divf %406, %407 : vector<2x128xf32>
    %409 = arith.mulf %408, %24 : vector<2x128xf32>
    %410 = arith.addf %409, %27 : vector<2x128xf32>
    %411 = vector.extract_strided_slice %410 {offsets = [0, 0], sizes = [2, 32], strides = [1, 1]} : vector<2x128xf32> to vector<2x32xf32>
    %412 = vector.extract_strided_slice %410 {offsets = [0, 32], sizes = [2, 32], strides = [1, 1]} : vector<2x128xf32> to vector<2x32xf32>
    %413 = vector.extract_strided_slice %410 {offsets = [0, 64], sizes = [2, 32], strides = [1, 1]} : vector<2x128xf32> to vector<2x32xf32>
    %414 = vector.extract_strided_slice %410 {offsets = [0, 96], sizes = [2, 32], strides = [1, 1]} : vector<2x128xf32> to vector<2x32xf32>
    %415 = arith.mulf %412, %391 : vector<2x32xf32>
    %416 = arith.mulf %411, %413 : vector<2x32xf32>
    %417 = arith.addf %415, %416 : vector<2x32xf32>
    %418 = math.tanh %417 : vector<2x32xf32>
    %419 = arith.mulf %414, %418 : vector<2x32xf32>
    %c56 = arith.constant 56 : index
    %c0_103 = arith.constant 0 : index
    %420 = vector.load %arg15[%c56, %c0_103] : memref<64x32xf32, #tpu.memory_space<vmem>>, vector<2x32xf32>
    tpu.vector_store %arg15[%c56, %c0_103], %419 {strides = array<i32>} : memref<64x32xf32, #tpu.memory_space<vmem>>, vector<2x32xf32>,
    %c0_104 = arith.constant 0 : index
    %c0_105 = arith.constant 0 : index
    %c0_106 = arith.constant 0 : index
    %421 = vector.load %arg12[%c0_104, %c0_105, %c0_106] : memref<2x2x32xf32, #tpu.memory_space<vmem>>, vector<1x2x32xf32>
    %422 = vector.shape_cast %421 : vector<1x2x32xf32> to vector<2x32xf32>
    %423 = vector.shape_cast %376 : vector<2x32xf32> to vector<1x2x32xf32>
    tpu.vector_store %arg12[%c0_104, %c0_105, %c0_106], %423 {strides = array<i32>} : memref<2x2x32xf32, #tpu.memory_space<vmem>>, vector<1x2x32xf32>,
    %c1_107 = arith.constant 1 : index
    %c0_108 = arith.constant 0 : index
    %c0_109 = arith.constant 0 : index
    %424 = vector.load %arg12[%c1_107, %c0_108, %c0_109] : memref<2x2x32xf32, #tpu.memory_space<vmem>>, vector<1x2x32xf32>
    %425 = vector.shape_cast %424 : vector<1x2x32xf32> to vector<2x32xf32>
    %426 = vector.shape_cast %419 : vector<2x32xf32> to vector<1x2x32xf32>
    tpu.vector_store %arg12[%c1_107, %c0_108, %c0_109], %426 {strides = array<i32>} : memref<2x2x32xf32, #tpu.memory_space<vmem>>, vector<1x2x32xf32>,
    %c0_110 = arith.constant 0 : index
    %c0_111 = arith.constant 0 : index
    %c0_112 = arith.constant 0 : index
    %427 = vector.load %arg13[%c0_110, %c0_111, %c0_112] : memref<2x2x32xf32, #tpu.memory_space<vmem>>, vector<1x2x32xf32>
    %428 = vector.shape_cast %427 : vector<1x2x32xf32> to vector<2x32xf32>
    %429 = vector.shape_cast %374 : vector<2x32xf32> to vector<1x2x32xf32>
    tpu.vector_store %arg13[%c0_110, %c0_111, %c0_112], %429 {strides = array<i32>} : memref<2x2x32xf32, #tpu.memory_space<vmem>>, vector<1x2x32xf32>,
    %c1_113 = arith.constant 1 : index
    %c0_114 = arith.constant 0 : index
    %c0_115 = arith.constant 0 : index
    %430 = vector.load %arg13[%c1_113, %c0_114, %c0_115] : memref<2x2x32xf32, #tpu.memory_space<vmem>>, vector<1x2x32xf32>
    %431 = vector.shape_cast %430 : vector<1x2x32xf32> to vector<2x32xf32>
    %432 = vector.shape_cast %417 : vector<2x32xf32> to vector<1x2x32xf32>
    tpu.vector_store %arg13[%c1_113, %c0_114, %c0_115], %432 {strides = array<i32>} : memref<2x2x32xf32, #tpu.memory_space<vmem>>, vector<1x2x32xf32>,
    %c0_116 = arith.constant 0 : index
    %c0_117 = arith.constant 0 : index
    %433 = vector.load %arg15[%c0_116, %c0_117] : memref<64x32xf32, #tpu.memory_space<vmem>>, vector<64x32xf32>
    %c0_118 = arith.constant 0 : index
    %c0_119 = arith.constant 0 : index
    %434 = vector.load %arg7[%c0_118, %c0_119] : memref<32x128xf32, #tpu.memory_space<vmem>>, vector<32x128xf32>
    %cst_120 = arith.constant dense<0.000000e+00> : vector<64x128xf32>
    %435 = tpu.matmul %433, %434, %cst_120 {dimension_numbers = #tpu.dot_dimension_numbers<[1], [0], [0], [1], [0, 0, 1, 1], [], []>} : vector<64x32xf32>, vector<32x128xf32>, vector<64x128xf32> -> vector<64x128xf32>
    %c0_121 = arith.constant 0 : index
    %c0_122 = arith.constant 0 : index
    %436 = vector.load %arg8[%c0_121, %c0_122] : memref<1x128xf32, #tpu.memory_space<vmem>>, vector<1x128xf32>
    %437 = vector.broadcast %436 : vector<1x128xf32> to vector<64x128xf32>
    %438 = arith.addf %435, %437 : vector<64x128xf32>
    %c0_123 = arith.constant 0 : index
    %c0_124 = arith.constant 0 : index
    %439 = vector.load %arg11[%c0_123, %c0_124] : memref<64x128xf32, #tpu.memory_space<vmem>>, vector<64x128xf32>
    tpu.vector_store %arg11[%c0_123, %c0_124], %438 {strides = array<i32>} : memref<64x128xf32, #tpu.memory_space<vmem>>, vector<64x128xf32>,
    return
  }
}

</mosaic_0001>

<bundles_post_ra>
// kernel: tpu_custom_call.1
= control target key start
LH: loop header
LB: loop body
LE: loop exit
PB: predicated region body
PF: predicated region fallthrough
CT: control target
= control target key end

     0   :  { %19 = vsyncpa [#allocation5], 0  ;;  %s3581_s0 = inlined_call_operand.hbm [shape: f32[16,32], index: 0, kind: input, shape index: {}]   ;;  %s3582_s1 = inlined_call_operand.hbm [shape: f32[32,128], index: 1, kind: input, shape index: {}]   ;;  %s3583_s2 = inlined_call_operand.hbm [shape: f32[32,128], index: 2, kind: input, shape index: {}]   ;;  %s3584_s3 = inlined_call_operand.vmem [shape: f32[1,128], index: 3, kind: input, shape index: {}]   ;;  %s3585_s4 = inlined_call_operand.hbm [shape: f32[32,128], index: 4, kind: input, shape index: {}]   ;;  %s3586_s5 = inlined_call_operand.hbm [shape: f32[32,128], index: 5, kind: input, shape index: {}]   ;;  %s3587_s6 = inlined_call_operand.vmem [shape: f32[1,128], index: 6, kind: input, shape index: {}]   ;;  %s3588_s7 = inlined_call_operand.hbm [shape: f32[32,128], index: 7, kind: input, shape index: {}]   ;;  %s3589_s8 = inlined_call_operand.vmem [shape: f32[1,128], index: 8, kind: input, shape index: {}]   ;;  %s3590_s9 = inlined_call_operand.vmem [shape: f32[2,2,32], index: 9, kind: input, shape index: {}]   ;;  %s3591_s10 = inlined_call_operand.vmem [shape: f32[2,2,32], index: 10, kind: input, shape index: {}]   ;;  %s3592_s11 = inlined_call_operand.hbm [shape: f32[64,128], index: 11, kind: output, shape index: {0}]   ;;  %s3593_s12 = inlined_call_operand.hbm [shape: f32[2,2,32], index: 12, kind: output, shape index: {1}]   ;;  %s3594_s13 = inlined_call_operand.hbm [shape: f32[2,2,32], index: 13, kind: output, shape index: {2}]  }
   0x1   :  { %20 = vsyncpa [#allocation8], 0 }
   0x2   :  { %21 = vsyncpa [#allocation11], 0 }
   0x3   :  { %22 = vsyncpa [#allocation14], 0 }
   0x4   :  { %23 = vsyncpa [#allocation6], 0 }
   0x5   :  { %24 = vsyncpa [#allocation17], 0  ;;  %s2956_s25 = smov [#allocation7]   ;;  %s2957_s27 = smov [#allocation10]  }
   0x6   :  { %s42_s26 = sshll.u32 %s2956_s25, 4  ;;  %s68_s28 = sshll.u32 %s2957_s27, 4  ;;  %s43_s26 = int_to_ptr.vmem [resolvable:$true] %s42_s26  ;;  %s3045_s28 = int_to_ptr.vmem [resolvable:$true] %s68_s28 }
   0x7   :  { %s2746_s14 = scalar_lea.hbm %s3582_s1, 512 }
   0x8   :  { %p2747_p0 = scmp.ne.s32.totalorder %s3582_s1, %s2746_s14  ;;  %p2750_p1 = scmp.lt.u32.totalorder %s2746_s14, %s3582_s1 }
   0xa   :  { %p2752_p2 = pnand %p2750_p1, %p2747_p0 }
   0xc   :  { %2755 = shalt.err (!%p2752_p2)
}
   0xd   :  { %s2756_s19 = scalar_lea.vmem %s43_s26, 512  ;;  %p2761_p4 = scmp.lt.s32.totalorder %s43_s26, %s43_s26 }
   0xe   :  { %p2757_p3 = scmp.ne.s32.totalorder %s43_s26, %s2756_s19  ;;  %p2762_p5 = scmp.lt.s32.totalorder %s2756_s19, %s2756_s19 }
  0x10   :  { %p2763_p6 = por %p2762_p5, %p2761_p4 }
  0x12   :  { %p2764_p7 = pnand %p2763_p6, %p2757_p3 }
  0x14   :  { %2767 = shalt.err (!%p2764_p7)
}
  0x15   :  { %s2958_s20 = smov 128   ;;  %s2959_s21 = smov 8  }
  0x16   :  { %48 = dma.hbm_to_vmem [thread:$0]  %s3582_s1, 512, %s43_s26, [#allocation8], %s2958_s20, %s2958_s20, %s2959_s21  }
  0x17   :  { %s2768_s27 = scalar_lea.hbm %s3585_s4, 512 }
  0x18   :  { %p2769_p8 = scmp.ne.s32.totalorder %s3585_s4, %s2768_s27  ;;  %p2772_p9 = scmp.lt.u32.totalorder %s2768_s27, %s3585_s4 }
  0x1a   :  { %p2774_p10 = pnand %p2772_p9, %p2769_p8 }
  0x1c   :  { %2777 = shalt.err (!%p2774_p10)
}
  0x1d   :  { %s2778_s16 = scalar_lea.vmem %s3045_s28, 512  ;;  %p2783_p12 = scmp.lt.s32.totalorder %s3045_s28, %s3045_s28 }
  0x1e   :  { %p2779_p11 = scmp.ne.s32.totalorder %s3045_s28, %s2778_s16  ;;  %p2784_p13 = scmp.lt.s32.totalorder %s2778_s16, %s2778_s16 }
  0x20   :  { %p2785_p0 = por %p2784_p13, %p2783_p12 }
  0x22   :  { %p2786_p1 = pnand %p2785_p0, %p2779_p11 }
  0x24   :  { %2789 = shalt.err (!%p2786_p1)
}
  0x25   :  { %74 = dma.hbm_to_vmem [thread:$0]  %s3585_s4, 512, %s3045_s28, [#allocation11], %s2958_s20, %s2958_s20, %s2959_s21  }
  0x26   :  { %s2960_s17 = smov [#allocation4]   ;;  %s2961_s19 = smov [#allocation9]  }
  0x27   :  { %s30_s18 = sshll.u32 %s2960_s17, 4  ;;  %s54_s22 = sshll.u32 %s2961_s19, 4  ;;  %s31_s18 = int_to_ptr.vmem [resolvable:$true] %s30_s18  ;;  %s3082_s22 = int_to_ptr.vmem [resolvable:$true] %s54_s22 }
  0x28   :  { %s2790_s25 = scalar_lea.hbm %s3581_s0, 256 }
  0x29   :  { %p2791_p2 = scmp.ne.s32.totalorder %s3581_s0, %s2790_s25  ;;  %p2794_p3 = scmp.lt.u32.totalorder %s2790_s25, %s3581_s0 }
  0x2b   :  { %p2796_p4 = pnand %p2794_p3, %p2791_p2 }
  0x2d   :  { %2799 = shalt.err (!%p2796_p4)
}
  0x2e   :  { %s2800_s4 = scalar_lea.vmem %s31_s18, 256  ;;  %p2805_p6 = scmp.lt.s32.totalorder %s31_s18, %s31_s18 }
  0x2f   :  { %p2801_p5 = scmp.ne.s32.totalorder %s31_s18, %s2800_s4  ;;  %p2806_p7 = scmp.lt.s32.totalorder %s2800_s4, %s2800_s4 }
  0x31   :  { %p2807_p8 = por %p2806_p7, %p2805_p6 }
  0x33   :  { %p2808_p9 = pnand %p2807_p8, %p2801_p5 }
  0x35   :  { %2811 = shalt.err (!%p2808_p9)
}
  0x36   :  { %36 = dma.hbm_to_vmem [thread:$0]  %s3581_s0, 256, %s31_s18, [#allocation5], %s2958_s20, %s2958_s20, %s2959_s21  }
  0x37   :  { %s2812_s26 = scalar_lea.hbm %s3583_s2, 512 }
  0x38   :  { %p2813_p10 = scmp.ne.s32.totalorder %s3583_s2, %s2812_s26  ;;  %p2816_p11 = scmp.lt.u32.totalorder %s2812_s26, %s3583_s2 }
  0x3a   :  { %p2818_p12 = pnand %p2816_p11, %p2813_p10 }
  0x3c   :  { %2821 = shalt.err (!%p2818_p12)
}
  0x3d   :  { %s2822_s25 = scalar_lea.vmem %s3082_s22, 512  ;;  %p2827_p0 = scmp.lt.s32.totalorder %s3082_s22, %s3082_s22 }
  0x3e   :  { %p2823_p13 = scmp.ne.s32.totalorder %s3082_s22, %s2822_s25  ;;  %p2828_p1 = scmp.lt.s32.totalorder %s2822_s25, %s2822_s25 }
  0x40   :  { %p2829_p2 = por %p2828_p1, %p2827_p0 }
  0x42   :  { %p2830_p3 = pnand %p2829_p2, %p2823_p13 }
  0x44   :  { %2833 = shalt.err (!%p2830_p3)
}
  0x45   :  { %60 = dma.hbm_to_vmem [thread:$0]  %s3583_s2, 512, %s3082_s22, [#allocation8], %s2958_s20, %s2958_s20, %s2959_s21  }
  0x46   :  { %s2962_s27 = smov [#allocation12]   ;;  %s2963_s30 = smov [#allocation13]  }
  0x47   :  { %s80_s29 = sshll.u32 %s2962_s27, 4  ;;  %s94_s14 = sshll.u32 %s2963_s30, 4  ;;  %s81_s29 = int_to_ptr.vmem [resolvable:$true] %s80_s29  ;;  %s3119_s14 = int_to_ptr.vmem [resolvable:$true] %s94_s14 }
  0x48   :  { %s2834_s15 = scalar_lea.hbm %s3586_s5, 512 }
  0x49   :  { %p2835_p4 = scmp.ne.s32.totalorder %s3586_s5, %s2834_s15  ;;  %p2838_p5 = scmp.lt.u32.totalorder %s2834_s15, %s3586_s5 }
  0x4b   :  { %p2840_p6 = pnand %p2838_p5, %p2835_p4 }
  0x4d   :  { %2843 = shalt.err (!%p2840_p6)
}
  0x4e   :  { %s2844_s2 = scalar_lea.vmem %s81_s29, 512  ;;  %p2849_p8 = scmp.lt.s32.totalorder %s81_s29, %s81_s29 }
  0x4f   :  { %p2845_p7 = scmp.ne.s32.totalorder %s81_s29, %s2844_s2  ;;  %p2850_p9 = scmp.lt.s32.totalorder %s2844_s2, %s2844_s2 }
  0x51   :  { %p2851_p10 = por %p2850_p9, %p2849_p8 }
  0x53   :  { %p2852_p11 = pnand %p2851_p10, %p2845_p7 }
  0x55   :  { %2855 = shalt.err (!%p2852_p11)
}
  0x56   :  { %86 = dma.hbm_to_vmem [thread:$0]  %s3586_s5, 512, %s81_s29, [#allocation11], %s2958_s20, %s2958_s20, %s2959_s21  }
  0x57   :  { %s2856_s25 = scalar_lea.hbm %s3588_s7, 512 }
  0x58   :  { %p2857_p12 = scmp.ne.s32.totalorder %s3588_s7, %s2856_s25  ;;  %p2860_p13 = scmp.lt.u32.totalorder %s2856_s25, %s3588_s7 }
  0x5a   :  { %p2862_p0 = pnand %p2860_p13, %p2857_p12 }
  0x5c   :  { %2865 = shalt.err (!%p2862_p0)
}
  0x5d   :  { %s2866_s4 = scalar_lea.vmem %s3119_s14, 512  ;;  %p2871_p2 = scmp.lt.s32.totalorder %s3119_s14, %s3119_s14 }
  0x5e   :  { %p2867_p1 = scmp.ne.s32.totalorder %s3119_s14, %s2866_s4  ;;  %p2872_p3 = scmp.lt.s32.totalorder %s2866_s4, %s2866_s4 }
  0x60   :  { %p2873_p4 = por %p2872_p3, %p2871_p2 }
  0x62   :  { %p2874_p5 = pnand %p2873_p4, %p2867_p1 }
  0x64   :  { %2877 = shalt.err (!%p2874_p5)
}
  0x65   :  { %100 = dma.hbm_to_vmem [thread:$0]  %s3588_s7, 512, %s3119_s14, [#allocation14], %s2958_s20, %s2958_s20, %s2959_s21  }
  0x66   :  { %2944 = dma.done.wait [#allocation5], 256  }
  0x67   :  { %2945 = vsyncadd [#allocation5], 4294967040 }
  0x68   :  { %2946 = dma.done.wait [#allocation8], 1024  }
  0x69   :  { %2947 = vsyncadd [#allocation8], 4294966272 }
  0x6a   :  { %2948 = dma.done.wait [#allocation11], 1024  }
  0x6b   :  { %2949 = vsyncadd [#allocation11], 4294966272 }
  0x6c   :  { %2950 = dma.done.wait [#allocation14], 512  }
  0x6d   :  { %2951 = vsyncadd [#allocation14], 4294966784  ;;  %vm125_vm0 = vcmask 261120   ;;  %v2964_v0 = vmov 0.0   ;;  %v136_v1 = vld [vmem:[#allocation7] sm:$0xff]  ;;  %v137_v2 = vld [vmem:[#allocation7 + $0x8] sm:$0xff]  ;;  %v249_v17 = vlaneseq }
  0x6e   :  { %126 = vst.msk [vmem:[#allocation3] sm:$0xff] %vm125_vm0, %v2964_v0  ;;  %127 = vst.msk [vmem:[#allocation3 + $0x8] sm:$0xff] %vm125_vm0, %v2964_v0  ;;  %435 = vmatprep.mubr.f32.mxu0 %v2964_v0  ;;  %v138_v3 = vld [vmem:[#allocation7 + $0x10] sm:$0xff]  ;;  %v2499_v4 = vpack.c.bf16 %v137_v2, %v136_v1  ;;  %v139_v5 = vld [vmem:[#allocation7 + $0x18] sm:$0xff]  ;;  %v2965_v12 = vmov 0.0|0.0   ;;  %vm2966_vm1 = vmmov 0  }
  0x6f   :  { %128 = vst.msk [vmem:[#allocation3 + $0x10] sm:$0xff] %vm125_vm0, %v2964_v0  ;;  %129 = vst.msk [vmem:[#allocation3 + $0x18] sm:$0xff] %vm125_vm0, %v2964_v0  ;;  %v134_v6 = vld [vmem:[#allocation4] sm:$0xff]  ;;  %v2503_v7 = vpack.c.bf16 %v139_v5, %v138_v3  ;;  %v230_v8 = vld [vmem:[#allocation9] sm:$0xff]  ;;  %v250_v22 = vand.u32 127, %v249_v17  ;;  %v2967_v26 = vmov 1.0  }
  0x70   :  { %130 = vst.msk [vmem:[#allocation3 + $0x20] sm:$0xff] %vm125_vm0, %v2964_v0  ;;  %131 = vst.msk [vmem:[#allocation3 + $0x28] sm:$0xff] %vm125_vm0, %v2964_v0  ;;  %2366 = vmatprep.mubr.msk.f32.mxu1 %vm125_vm0, %v134_v6  ;;  %2500 = vmatprep.subr.bf16.mxu1 %v2499_v4  ;;  %v231_v9 = vld [vmem:[#allocation9 + $0x8] sm:$0xff]  ;;  %v135_v10 = vld [vmem:[#allocation4 + $0x8] sm:$0xff]  ;;  %s2969_s26 = smov 32   ;;  %vm579_vm5 = vcmask 254976  }
  0x71   :  { %132 = vst.msk [vmem:[#allocation3 + $0x30] sm:$0xff] %vm125_vm0, %v2964_v0  ;;  %133 = vst.msk [vmem:[#allocation3 + $0x38] sm:$0xff] %vm125_vm0, %v2964_v0  ;;  %2502 = vmatpush3.bf16.msra.mxu1 %v2499_v4  ;;  %v3174_v11 = vpack.c.bf16 %v231_v9, %v230_v8  ;;  %v232_v13 = vld [vmem:[#allocation9 + $0x10] sm:$0xff]  ;;  %v233_v14 = vld [vmem:[#allocation9 + $0x18] sm:$0xff]  ;;  %vm251_vm2 = vcmp.ge.s32.totalorder %v250_v22, 64  ;;  %vm252_vm3 = vcmp.lt.s32.totalorder %v250_v22, 96 }
  0x72   :  { %2504 = vmatprep.subr.bf16.mxu1 %v2503_v7  ;;  %v3179_v15 = vpack.c.bf16 %v233_v14, %v232_v13  ;;  %v256_v16 = vld [vmem:[%s3590_s9] sm:$0x3]  ;;  %vm253_vm4 = vmand %vm251_vm2, %vm252_vm3  ;;  %v235_v46 = vld [vmem:[#allocation10 + $0x8] sm:$0xff]  ;;  %s2971_s24 = smov [#allocation16]  }
  0x73   :  { %v2242_v18 = vld [vmem:[%s3584_s3] ss:$0 sm:$0xff]  ;;  %v3195_v27 = vsel %vm253_vm4, 2.0, %v2967_v26  ;;  %v3199_v35 = vsel %vm253_vm4, -1.0, %v2964_v0  ;;  %s2968_s3 = smov 64   ;;  %v239_v49 = vld [vmem:[#allocation12 + $0x8] sm:$0xff] }
  0x74   :  { %v340_v38 = vld [vmem:[%s3591_s10] sm:$0x3]  ;;  %v236_v50 = vld [vmem:[#allocation10 + $0x10] sm:$0xff]  ;;  %v237_v51 = vld [vmem:[#allocation10 + $0x18] sm:$0xff]  ;;  %s2208_s25 = sshll.u32 %s2971_s24, 4  ;;  %s2209_s25 = int_to_ptr.vmem [resolvable:$true] %s2208_s25 }
  0x75   :  { %2506 = vmatpush3.bf16.msra.mxu1 %v2503_v7  ;;  %v234_v45 = vld [vmem:[#allocation10] sm:$0xff]  ;;  %v3216_v53 = vpack.c.bf16 %v237_v51, %v236_v50  ;;  %v240_v54 = vld [vmem:[#allocation12 + $0x10] sm:$0xff]  ;;  %v241_v55 = vld [vmem:[#allocation12 + $0x18] sm:$0xff]  ;;  %s2878_s0 = scalar_lea.vmem %s2209_s25, 64  ;;  %p2883_p7 = scmp.lt.s32.totalorder %s2209_s25, %s2209_s25 }
  0x76   :  { %2507 = vmatprep.subr.bf16.mxu1 %v2965_v12  ;;  %v238_v47 = vld [vmem:[#allocation12] sm:$0xff]  ;;  %v3212_v48 = vpack.c.bf16 %v235_v46, %v234_v45  ;;  %v3221_v56 = vpack.c.bf16 %v241_v55, %v240_v54  ;;  %p2879_p6 = scmp.ne.s32.totalorder %s2209_s25, %s2878_s0  ;;  %p2884_p8 = scmp.lt.s32.totalorder %s2878_s0, %s2878_s0 }
  0x77   :  { %v3214_v52 = vpack.c.bf16 %v239_v49, %v238_v47  ;;  %v2248_v58 = vld [vmem:[%s3590_s9 + $0x2] sm:$0x3]  ;;  %v3250_v4 = vld [vmem:[%s3587_s6] ss:$0 sm:$0xff] }
  0x78   :  { %2367 = vmatmul.mubr.msk.f32.vlgmr.msra.gmra.mrb[0].mxu1 %vm125_vm0, %v135_v10  ;;  %2514 = vmatprep.subr.bf16.mxu0 %v3212_v48  ;;  %p2885_p9 = por %p2884_p8, %p2883_p7 }
  0x79   :  { %2509 = vmatpush3.bf16.msra.mxu1 %v3174_v11  ;;  %2377 = vmatprep.mubr.msk.f32.mxu1 %vm2966_vm1, %v2964_v0 }
  0x7a   :  { %2510 = vmatprep.subr.bf16.mxu1 %v2965_v12  ;;  %2516 = vmatpush1.bf16.msra.mxu0 %v3174_v11  ;;  %p2886_p10 = pnand %p2885_p9, %p2879_p6 }
  0x7b   :  { %2518 = vmatprep.subr.bf16.mxu0 %v3216_v53 }
  0x7d   :  { %2512 = vmatpush3.bf16.msra.mxu1 %v3179_v15 }
  0x7e   :  { %2521 = vmatprep.subr.bf16.mxu1 %v2965_v12  ;;  %2520 = vmatpush1.bf16.msra.mxu0 %v3179_v15 }
  0x7f   :  { %2528 = vmatprep.subr.bf16.mxu0 %v3212_v48 }
  0x80   :  { %2378 = vmatmul.mubr.msk.f32.vlgmr.msra.gmra.mrb[2].mxu1 %vm125_vm0, %v256_v16 }
  0x81   :  { %2388 = vmatprep.mubr.msk.f32.mxu1 %vm2966_vm1, %v2964_v0  ;;  %2523 = vmatpush3.bf16.msra.mxu1 %v3214_v52 }
  0x82   :  { %2524 = vmatprep.subr.bf16.mxu1 %v2965_v12 }
  0x85   :  { %2526 = vmatpush3.bf16.msra.mxu1 %v3221_v56 }
  0x86   :  { %2535 = vmatprep.subr.bf16.mxu1 %v2965_v12 }
  0x88   :  { %2389 = vmatmul.mubr.msk.f32.vlgmr.msra.gmra.mrb[4].mxu1 %vm125_vm0, %v2248_v58 }
  0x89   :  { %2537 = vmatpush3.bf16.msra.mxu1 %v3214_v52  ;;  %2399 = vmatprep.mubr.msk.f32.mxu1 %vm2966_vm1, %v2964_v0 }
  0x8a   :  { %2538 = vmatprep.subr.bf16.mxu1 %v2965_v12 }
  0x8d   :  { %2540 = vmatpush3.bf16.msra.mxu1 %v3221_v56 }
  0x8e   :  { %2549 = vmatprep.subr.bf16.mxu1 %v2965_v12 }
 0x14b   :  { %v2368_v19 = vpop.f32.mrb[0].mxu1 }
 0x14c   :  { %v225_v20 = vadd.f32 %v2368_v19, %v2242_v18  ;;  %v219_v21 = vpop.f32.mrb[1].mxu1 }
 0x14d   :  { %v220_v23 = vadd.f32 %v2242_v18, %v219_v21 }
 0x14e   :  { %229 = vst [vmem:[#allocation2 + $0x8] sm:$0xff] %v225_v20 }
 0x14f   :  { %228 = vst [vmem:[#allocation2] sm:$0xff] %v220_v23 }
 0x153   :  { %v327_v24 = vpop.f32.mrb[2].mxu1 }
 0x154   :  { %v2379_v25 = vpop.f32.mrb[3].mxu1 }
 0x155   :  { %v2249_v25 = vld [vmem:[%s3591_s10 + $0x2] sm:$0x3] }
 0x156   :  { %v257_v28 = vld [vmem:[#allocation2] sm:$0x3]  ;;  %v515_v2 = vld [vmem:[#allocation2 + $0x2] sm:$0x3]  ;;  %v729_v49 = vld [vmem:[#allocation2 + $0x4] sm:$0x3] }
 0x157   :  { %v328_v29 = vadd.f32 %v327_v24, %v257_v28 }
 0x159   :  { %v331_v30 = vmul.f32 %v328_v29, %v3195_v27 }
 0x15b   :  { %v2247_v31 = vmul.f32 -1.442695, %v331_v30  ;;  %v511_v62 = vpop.f32.mrb[4].mxu1 }
 0x15c   :  { %v2390_v63 = vpop.f32.mrb[5].mxu1 }
 0x15d   :  { %2650 = vpow2.f32 %v2247_v31 }
 0x167   :  { %v2651_v32 = vpop.eup %2650 }
 0x168   :  { %v335_v33 = vadd.f32 1.0, %v2651_v32 }
 0x16a   :  { %2652 = vrcp.f32 %v335_v33 }
 0x174   :  { %v2653_v34 = vpop.eup %2652 }
 0x175   :  { %v338_v36 = vmul.f32 %v2653_v34, %v3195_v27 }
 0x177   :  { %v339_v37 = vadd.f32 %v338_v36, %v3199_v35 }
 0x179   :  { %347 = vrot.lane.b32.xlu0 %v339_v37, %s2968_s3 }
 0x17d   :  { %342 = vrot.lane.b32.xlu0 %v340_v38, %s2969_s26 }
 0x1eb   :  { %v348_v39 = vpop.permute.xlu0 %347 }
 0x1ec   :  { %v350_v40 = vmul.f32 %v348_v39, %v339_v37 }
 0x1ee   :  { %352 = vrot.lane.b32.xlu1 %v350_v40, %s2969_s26 }
 0x1ef   :  { %v343_v41 = vpop.permute.xlu0 %342 }
 0x1f0   :  { %v345_v42 = vmul.f32 %v343_v41, %v339_v37 }
 0x260   :  { %v353_v43 = vpop.permute.xlu1 %352 }
 0x261   :  { %v3209_v44 = vadd.f32 %v353_v43, %v345_v42 }
 0x263   :  { %2654 = vtanh.f32 %v3209_v44 }
 0x26d   :  { %v2655_v57 = vpop.eup %2654 }
 0x26e   :  { %358 = vrot.lane.b32.xlu1 %v2655_v57, %s2968_s3 }
 0x2e0   :  { %v359_v59 = vpop.permute.xlu1 %358 }
 0x2e1   :  { %v361_v60 = vmul.f32 %v359_v59, %v339_v37 }
 0x2e3   :  { %367 = vrot.lane.b32.xlu0 %v361_v60, %s2969_s26 }
 0x355   :  { %v368_v61 = vpop.permute.xlu0 %367 }
 0x356   :  { %2250 = vmatmul.mubr.msk.f32.vlgmr.msra.gmra.mrb[0].mxu0 %vm125_vm0, %v368_v61 }
 0x357   :  { %2530 = vmatpush1.bf16.msra.mxu0 %v3174_v11  ;;  %650 = vmatprep.mubr.f32.mxu0 %v2964_v0 }
 0x358   :  { %2532 = vmatprep.subr.bf16.mxu0 %v3216_v53 }
 0x35b   :  { %2534 = vmatpush1.bf16.msra.mxu0 %v3179_v15 }
 0x35c   :  { %2542 = vmatprep.subr.bf16.mxu0 %v3212_v48 }
 0x429   :  { %v437_v1 = vpop.f32.mrb[0].mxu0 }
 0x42a   :  { %v516_v3 = vadd.f32 %v515_v2, %v437_v1  ;;  %v439_v5 = vpop.f32.mrb[1].mxu0 }
 0x42b   :  { %v517_v6 = vadd.f32 %v511_v62, %v439_v5 }
 0x42c   :  { %v519_v7 = vmul.f32 %v516_v3, %v3195_v27 }
 0x42d   :  { %v518_v8 = vadd.f32 %v3250_v4, %v517_v6 }
 0x42e   :  { %v2252_v9 = vmul.f32 -1.442695, %v519_v7 }
 0x42f   :  { %v545_v10 = vmul.f32 %v518_v8, %v3195_v27 }
 0x430   :  { %2656 = vpow2.f32 %v2252_v9 }
 0x431   :  { %v2253_v13 = vmul.f32 -1.442695, %v545_v10 }
 0x433   :  { %2658 = vpow2.f32 %v2253_v13 }
 0x43a   :  { %v2657_v14 = vpop.eup %2656 }
 0x43b   :  { %v523_v16 = vadd.f32 1.0, %v2657_v14 }
 0x43d   :  { %v2659_v17 = vpop.eup %2658  ;;  %2660 = vrcp.f32 %v523_v16 }
 0x43e   :  { %v549_v18 = vadd.f32 1.0, %v2659_v17 }
 0x440   :  { %2662 = vrcp.f32 %v549_v18 }
 0x447   :  { %v2661_v19 = vpop.eup %2660 }
 0x448   :  { %v526_v20 = vmul.f32 %v2661_v19, %v3195_v27 }
 0x44a   :  { %v2663_v21 = vpop.eup %2662  ;;  %v527_v22 = vadd.f32 %v526_v20, %v3199_v35 }
 0x44b   :  { %v552_v23 = vmul.f32 %v2663_v21, %v3195_v27 }
 0x44c   :  { %530 = vrot.lane.b32.xlu1 %v527_v22, %s2968_s3  ;;  %v528_v32 = vmul.f32 %v527_v22, %v3209_v44 }
 0x44d   :  { %v553_v24 = vadd.f32 %v552_v23, %v3199_v35 }
 0x44f   :  { %560 = vrot.lane.b32.xlu0 %v553_v24, %s2968_s3 }
 0x450   :  { %555 = vrot.lane.b32.xlu1 %v2249_v25, %s2969_s26 }
 0x4be   :  { %v531_v26 = vpop.permute.xlu1 %530 }
 0x4bf   :  { %v533_v28 = vmul.f32 %v531_v26, %v527_v22 }
 0x4c1   :  { %535 = vrot.lane.b32.xlu0 %v533_v28, %s2969_s26  ;;  %v561_v29 = vpop.permute.xlu0 %560 }
 0x4c2   :  { %v563_v30 = vmul.f32 %v561_v29, %v553_v24  ;;  %v556_v31 = vpop.permute.xlu1 %555 }
 0x4c3   :  { %v558_v36 = vmul.f32 %v556_v31, %v553_v24 }
 0x4c4   :  { %565 = vrot.lane.b32.xlu1 %v563_v30, %s2969_s26 }
 0x533   :  { %v536_v33 = vpop.permute.xlu0 %535 }
 0x534   :  { %v3268_v34 = vadd.f32 %v536_v33, %v528_v32 }
 0x536   :  { %2664 = vtanh.f32 %v3268_v34  ;;  %v566_v37 = vpop.permute.xlu1 %565 }
 0x537   :  { %v3271_v38 = vadd.f32 %v566_v37, %v558_v36 }
 0x539   :  { %2666 = vtanh.f32 %v3271_v38 }
 0x540   :  { %v2665_v39 = vpop.eup %2664 }
 0x541   :  { %541 = vrot.lane.b32.xlu0 %v2665_v39, %s2968_s3 }
 0x543   :  { %v2667_v40 = vpop.eup %2666 }
 0x544   :  { %571 = vrot.lane.b32.xlu1 %v2667_v40, %s2968_s3 }
 0x5b3   :  { %v542_v41 = vpop.permute.xlu0 %541 }
 0x5b4   :  { %v544_v42 = vmul.f32 %v542_v41, %v527_v22 }
 0x5b6   :  { %582 = vrot.lane.b32.xlu0 %v544_v42, %s2969_s26  ;;  %v572_v43 = vpop.permute.xlu1 %571 }
 0x5b7   :  { %v574_v44 = vmul.f32 %v572_v43, %v553_v24 }
 0x5b9   :  { %576 = vrot.lane.b32.xlu1 %v574_v44, %s2969_s26 }
 0x628   :  { %v583_v45 = vpop.permute.xlu0 %582 }
 0x629   :  { %2254 = vmatmul.mubr.msk.f32.vlgmr.msra.gmra.mrb[2].mxu0 %vm125_vm0, %v583_v45 }
 0x62a   :  { %2544 = vmatpush1.bf16.msra.mxu0 %v3174_v11  ;;  %860 = vmatprep.mubr.f32.mxu0 %v2964_v0 }
 0x62b   :  { %v577_v46 = vpop.permute.xlu1 %576  ;;  %2546 = vmatprep.subr.bf16.mxu0 %v3216_v53 }
 0x62c   :  { %580 = vst.msk [vmem:[#allocation3] sm:$0x3] %vm579_vm5, %v577_v46  ;;  %2400 = vmatmul.mubr.msk.f32.vlgmr.msra.gmra.mrb[6].mxu1 %vm125_vm0, %v577_v46 }
 0x62d   :  { %2551 = vmatpush3.bf16.msra.mxu1 %v3214_v52  ;;  %2410 = vmatprep.mubr.msk.f32.mxu1 %vm2966_vm1, %v2964_v0 }
 0x62e   :  { %2548 = vmatpush1.bf16.msra.mxu0 %v3179_v15  ;;  %2552 = vmatprep.subr.bf16.mxu1 %v2965_v12 }
 0x62f   :  { %2556 = vmatprep.subr.bf16.mxu0 %v3212_v48 }
 0x631   :  { %2554 = vmatpush3.bf16.msra.mxu1 %v3221_v56 }
 0x632   :  { %2563 = vmatprep.subr.bf16.mxu1 %v2965_v12 }
 0x6fc   :  { %v652_v47 = vpop.f32.mrb[2].mxu0 }
 0x6fd   :  { %v730_v50 = vadd.f32 %v729_v49, %v652_v47  ;;  %v654_v51 = vpop.f32.mrb[3].mxu0 }
 0x6ff   :  { %v733_v54 = vmul.f32 %v730_v50, %v3195_v27  ;;  %v725_v55 = vpop.f32.mrb[6].mxu1 }
 0x700   :  { %v731_v57 = vadd.f32 %v725_v55, %v654_v51  ;;  %v2401_v58 = vpop.f32.mrb[7].mxu1 }
 0x701   :  { %v2256_v59 = vmul.f32 -1.442695, %v733_v54 }
 0x702   :  { %v732_v60 = vadd.f32 %v3250_v4, %v731_v57 }
 0x703   :  { %2668 = vpow2.f32 %v2256_v59 }
 0x704   :  { %v759_v61 = vmul.f32 %v732_v60, %v3195_v27 }
 0x706   :  { %v2257_v62 = vmul.f32 -1.442695, %v759_v61 }
 0x708   :  { %2670 = vpow2.f32 %v2257_v62 }
 0x70d   :  { %v2669_v63 = vpop.eup %2668 }
 0x70e   :  { %v737_v1 = vadd.f32 1.0, %v2669_v63 }
 0x710   :  { %2672 = vrcp.f32 %v737_v1 }
 0x712   :  { %v2671_v2 = vpop.eup %2670 }
 0x713   :  { %v763_v3 = vadd.f32 1.0, %v2671_v2 }
 0x715   :  { %2674 = vrcp.f32 %v763_v3 }
 0x71a   :  { %v2673_v5 = vpop.eup %2672 }
 0x71b   :  { %v740_v6 = vmul.f32 %v2673_v5, %v3195_v27 }
 0x71d   :  { %v741_v7 = vadd.f32 %v740_v6, %v3199_v35 }
 0x71f   :  { %v2675_v8 = vpop.eup %2674  ;;  %744 = vrot.lane.b32.xlu0 %v741_v7, %s2968_s3  ;;  %v742_v18 = vmul.f32 %v741_v7, %v3268_v34  ;;  %v939_v34 = vld [vmem:[#allocation2 + $0x6] sm:$0x3] }
 0x720   :  { %v766_v9 = vmul.f32 %v2675_v8, %v3195_v27 }
 0x722   :  { %v767_v10 = vadd.f32 %v766_v9, %v3199_v35 }
 0x724   :  { %770 = vrot.lane.b32.xlu1 %v767_v10, %s2968_s3  ;;  %v768_v21 = vmul.f32 %v767_v10, %v3271_v38 }
 0x791   :  { %v745_v13 = vpop.permute.xlu0 %744 }
 0x792   :  { %v747_v14 = vmul.f32 %v745_v13, %v741_v7 }
 0x794   :  { %749 = vrot.lane.b32.xlu0 %v747_v14, %s2969_s26 }
 0x796   :  { %v771_v16 = vpop.permute.xlu1 %770 }
 0x797   :  { %v773_v17 = vmul.f32 %v771_v16, %v767_v10 }
 0x799   :  { %775 = vrot.lane.b32.xlu1 %v773_v17, %s2969_s26 }
 0x806   :  { %v750_v19 = vpop.permute.xlu0 %749 }
 0x807   :  { %v3304_v20 = vadd.f32 %v750_v19, %v742_v18 }
 0x809   :  { %2676 = vtanh.f32 %v3304_v20 }
 0x80b   :  { %v776_v22 = vpop.permute.xlu1 %775 }
 0x80c   :  { %v3308_v23 = vadd.f32 %v776_v22, %v768_v21 }
 0x80e   :  { %2678 = vtanh.f32 %v3308_v23 }
 0x813   :  { %v2677_v24 = vpop.eup %2676 }
 0x814   :  { %755 = vrot.lane.b32.xlu0 %v2677_v24, %s2968_s3 }
 0x818   :  { %v2679_v25 = vpop.eup %2678 }
 0x819   :  { %781 = vrot.lane.b32.xlu1 %v2679_v25, %s2968_s3 }
 0x886   :  { %v756_v26 = vpop.permute.xlu0 %755 }
 0x887   :  { %v758_v28 = vmul.f32 %v756_v26, %v741_v7 }
 0x889   :  { %792 = vrot.lane.b32.xlu0 %v758_v28, %s2969_s26 }
 0x88b   :  { %v782_v29 = vpop.permute.xlu1 %781 }
 0x88c   :  { %v784_v30 = vmul.f32 %v782_v29, %v767_v10 }
 0x88e   :  { %786 = vrot.lane.b32.xlu1 %v784_v30, %s2969_s26 }
 0x8fb   :  { %v793_v31 = vpop.permute.xlu0 %792 }
 0x8fc   :  { %2258 = vmatmul.mubr.msk.f32.vlgmr.msra.gmra.mrb[4].mxu0 %vm125_vm0, %v793_v31 }
 0x8fd   :  { %2558 = vmatpush1.bf16.msra.mxu0 %v3174_v11  ;;  %1070 = vmatprep.mubr.f32.mxu0 %v2964_v0 }
 0x8fe   :  { %2560 = vmatprep.subr.bf16.mxu0 %v3216_v53 }
 0x900   :  { %v787_v32 = vpop.permute.xlu1 %786 }
 0x901   :  { %790 = vst.msk [vmem:[#allocation3 + $0x8] sm:$0x3] %vm579_vm5, %v787_v32  ;;  %2411 = vmatmul.mubr.msk.f32.vlgmr.msra.gmra.mrb[8].mxu1 %vm125_vm0, %v787_v32  ;;  %2562 = vmatpush1.bf16.msra.mxu0 %v3179_v15 }
 0x902   :  { %2565 = vmatpush3.bf16.msra.mxu1 %v3214_v52  ;;  %2421 = vmatprep.mubr.msk.f32.mxu1 %vm2966_vm1, %v2964_v0 }
 0x903   :  { %2566 = vmatprep.subr.bf16.mxu1 %v2965_v12  ;;  %2570 = vmatprep.subr.bf16.mxu0 %v3212_v48 }
 0x906   :  { %2568 = vmatpush3.bf16.msra.mxu1 %v3221_v56 }
 0x907   :  { %2577 = vmatprep.subr.bf16.mxu1 %v2965_v12 }
 0x9cf   :  { %v862_v33 = vpop.f32.mrb[4].mxu0 }
 0x9d0   :  { %v940_v36 = vadd.f32 %v939_v34, %v862_v33  ;;  %v864_v37 = vpop.f32.mrb[5].mxu0 }
 0x9d2   :  { %v943_v38 = vmul.f32 %v940_v36, %v3195_v27 }
 0x9d4   :  { %v2260_v39 = vmul.f32 -1.442695, %v943_v38  ;;  %v935_v40 = vpop.f32.mrb[8].mxu1 }
 0x9d5   :  { %v941_v41 = vadd.f32 %v935_v40, %v864_v37  ;;  %v2412_v42 = vpop.f32.mrb[9].mxu1 }
 0x9d6   :  { %2680 = vpow2.f32 %v2260_v39 }
 0x9d7   :  { %v942_v43 = vadd.f32 %v3250_v4, %v941_v41 }
 0x9d9   :  { %v969_v44 = vmul.f32 %v942_v43, %v3195_v27 }
 0x9db   :  { %v2261_v45 = vmul.f32 -1.442695, %v969_v44 }
 0x9dd   :  { %2682 = vpow2.f32 %v2261_v45 }
 0x9e0   :  { %v2681_v46 = vpop.eup %2680 }
 0x9e1   :  { %v947_v47 = vadd.f32 1.0, %v2681_v46 }
 0x9e3   :  { %2684 = vrcp.f32 %v947_v47 }
 0x9e7   :  { %v2683_v49 = vpop.eup %2682 }
 0x9e8   :  { %v973_v50 = vadd.f32 1.0, %v2683_v49 }
 0x9ea   :  { %2686 = vrcp.f32 %v973_v50 }
 0x9ed   :  { %v2685_v51 = vpop.eup %2684 }
 0x9ee   :  { %v950_v54 = vmul.f32 %v2685_v51, %v3195_v27 }
 0x9f0   :  { %v951_v55 = vadd.f32 %v950_v54, %v3199_v35 }
 0x9f2   :  { %954 = vrot.lane.b32.xlu0 %v951_v55, %s2968_s3  ;;  %v952_v1 = vmul.f32 %v951_v55, %v3304_v20  ;;  %v1149_v20 = vld [vmem:[#allocation2 + $0x8] sm:$0x3] }
 0x9f4   :  { %v2687_v57 = vpop.eup %2686 }
 0x9f5   :  { %v976_v58 = vmul.f32 %v2687_v57, %v3195_v27 }
 0x9f7   :  { %v977_v59 = vadd.f32 %v976_v58, %v3199_v35 }
 0x9f9   :  { %980 = vrot.lane.b32.xlu1 %v977_v59, %s2968_s3  ;;  %v978_v5 = vmul.f32 %v977_v59, %v3308_v23 }
 0xa64   :  { %v955_v60 = vpop.permute.xlu0 %954 }
 0xa65   :  { %v957_v61 = vmul.f32 %v955_v60, %v951_v55 }
 0xa67   :  { %959 = vrot.lane.b32.xlu0 %v957_v61, %s2969_s26 }
 0xa6b   :  { %v981_v62 = vpop.permute.xlu1 %980 }
 0xa6c   :  { %v983_v63 = vmul.f32 %v981_v62, %v977_v59 }
 0xa6e   :  { %985 = vrot.lane.b32.xlu1 %v983_v63, %s2969_s26 }
 0xad9   :  { %v960_v2 = vpop.permute.xlu0 %959 }
 0xada   :  { %v3341_v3 = vadd.f32 %v960_v2, %v952_v1 }
 0xadc   :  { %2688 = vtanh.f32 %v3341_v3 }
 0xae0   :  { %v986_v6 = vpop.permute.xlu1 %985 }
 0xae1   :  { %v3345_v7 = vadd.f32 %v986_v6, %v978_v5 }
 0xae3   :  { %2690 = vtanh.f32 %v3345_v7 }
 0xae6   :  { %v2689_v8 = vpop.eup %2688 }
 0xae7   :  { %965 = vrot.lane.b32.xlu0 %v2689_v8, %s2968_s3 }
 0xaed   :  { %v2691_v9 = vpop.eup %2690 }
 0xaee   :  { %991 = vrot.lane.b32.xlu1 %v2691_v9, %s2968_s3 }
 0xb59   :  { %v966_v10 = vpop.permute.xlu0 %965 }
 0xb5a   :  { %v968_v13 = vmul.f32 %v966_v10, %v951_v55 }
 0xb5c   :  { %1002 = vrot.lane.b32.xlu0 %v968_v13, %s2969_s26 }
 0xb60   :  { %v992_v14 = vpop.permute.xlu1 %991 }
 0xb61   :  { %v994_v16 = vmul.f32 %v992_v14, %v977_v59 }
 0xb63   :  { %996 = vrot.lane.b32.xlu1 %v994_v16, %s2969_s26 }
 0xbce   :  { %v1003_v17 = vpop.permute.xlu0 %1002 }
 0xbcf   :  { %2262 = vmatmul.mubr.msk.f32.vlgmr.msra.gmra.mrb[6].mxu0 %vm125_vm0, %v1003_v17 }
 0xbd0   :  { %2572 = vmatpush1.bf16.msra.mxu0 %v3174_v11  ;;  %1280 = vmatprep.mubr.f32.mxu0 %v2964_v0 }
 0xbd1   :  { %2574 = vmatprep.subr.bf16.mxu0 %v3216_v53 }
 0xbd4   :  { %2576 = vmatpush1.bf16.msra.mxu0 %v3179_v15 }
 0xbd5   :  { %v997_v18 = vpop.permute.xlu1 %996  ;;  %2584 = vmatprep.subr.bf16.mxu0 %v3212_v48 }
 0xbd6   :  { %1000 = vst.msk [vmem:[#allocation3 + $0x10] sm:$0x3] %vm579_vm5, %v997_v18  ;;  %2422 = vmatmul.mubr.msk.f32.vlgmr.msra.gmra.mrb[10].mxu1 %vm125_vm0, %v997_v18 }
 0xbd7   :  { %2579 = vmatpush3.bf16.msra.mxu1 %v3214_v52  ;;  %2432 = vmatprep.mubr.msk.f32.mxu1 %vm2966_vm1, %v2964_v0 }
 0xbd8   :  { %2580 = vmatprep.subr.bf16.mxu1 %v2965_v12 }
 0xbdb   :  { %2582 = vmatpush3.bf16.msra.mxu1 %v3221_v56 }
 0xbdc   :  { %2591 = vmatprep.subr.bf16.mxu1 %v2965_v12 }
 0xca2   :  { %v1072_v19 = vpop.f32.mrb[6].mxu0 }
 0xca3   :  { %v1150_v21 = vadd.f32 %v1149_v20, %v1072_v19  ;;  %v1074_v22 = vpop.f32.mrb[7].mxu0 }
 0xca5   :  { %v1153_v23 = vmul.f32 %v1150_v21, %v3195_v27 }
 0xca7   :  { %v2264_v24 = vmul.f32 -1.442695, %v1153_v23 }
 0xca9   :  { %2692 = vpow2.f32 %v2264_v24  ;;  %v1145_v25 = vpop.f32.mrb[10].mxu1 }
 0xcaa   :  { %v1151_v26 = vadd.f32 %v1145_v25, %v1074_v22  ;;  %v2423_v28 = vpop.f32.mrb[11].mxu1 }
 0xcac   :  { %v1152_v29 = vadd.f32 %v3250_v4, %v1151_v26 }
 0xcae   :  { %v1179_v30 = vmul.f32 %v1152_v29, %v3195_v27 }
 0xcb0   :  { %v2265_v31 = vmul.f32 -1.442695, %v1179_v30 }
 0xcb2   :  { %2694 = vpow2.f32 %v2265_v31 }
 0xcb3   :  { %v2693_v32 = vpop.eup %2692 }
 0xcb4   :  { %v1157_v33 = vadd.f32 1.0, %v2693_v32 }
 0xcb6   :  { %2696 = vrcp.f32 %v1157_v33 }
 0xcbc   :  { %v2695_v34 = vpop.eup %2694 }
 0xcbd   :  { %v1183_v36 = vadd.f32 1.0, %v2695_v34 }
 0xcbf   :  { %2698 = vrcp.f32 %v1183_v36 }
 0xcc0   :  { %v2697_v37 = vpop.eup %2696 }
 0xcc1   :  { %v1160_v38 = vmul.f32 %v2697_v37, %v3195_v27 }
 0xcc3   :  { %v1161_v39 = vadd.f32 %v1160_v38, %v3199_v35 }
 0xcc5   :  { %1164 = vrot.lane.b32.xlu0 %v1161_v39, %s2968_s3  ;;  %v1162_v47 = vmul.f32 %v1161_v39, %v3341_v3  ;;  %v1359_v3 = vld [vmem:[#allocation2 + $0xa] sm:$0x3] }
 0xcc9   :  { %v2699_v40 = vpop.eup %2698 }
 0xcca   :  { %v1186_v41 = vmul.f32 %v2699_v40, %v3195_v27 }
 0xccc   :  { %v1187_v42 = vadd.f32 %v1186_v41, %v3199_v35 }
 0xcce   :  { %1190 = vrot.lane.b32.xlu1 %v1187_v42, %s2968_s3  ;;  %v1188_v51 = vmul.f32 %v1187_v42, %v3345_v7 }
 0xd37   :  { %v1165_v43 = vpop.permute.xlu0 %1164 }
 0xd38   :  { %v1167_v44 = vmul.f32 %v1165_v43, %v1161_v39 }
 0xd3a   :  { %1169 = vrot.lane.b32.xlu0 %v1167_v44, %s2969_s26 }
 0xd40   :  { %v1191_v45 = vpop.permute.xlu1 %1190 }
 0xd41   :  { %v1193_v46 = vmul.f32 %v1191_v45, %v1187_v42 }
 0xd43   :  { %1195 = vrot.lane.b32.xlu1 %v1193_v46, %s2969_s26 }
 0xdac   :  { %v1170_v49 = vpop.permute.xlu0 %1169 }
 0xdad   :  { %v3378_v50 = vadd.f32 %v1170_v49, %v1162_v47 }
 0xdaf   :  { %2700 = vtanh.f32 %v3378_v50 }
 0xdb5   :  { %v1196_v54 = vpop.permute.xlu1 %1195 }
 0xdb6   :  { %v3382_v55 = vadd.f32 %v1196_v54, %v1188_v51 }
 0xdb8   :  { %2702 = vtanh.f32 %v3382_v55 }
 0xdb9   :  { %v2701_v57 = vpop.eup %2700 }
 0xdba   :  { %1175 = vrot.lane.b32.xlu0 %v2701_v57, %s2968_s3 }
 0xdc2   :  { %v2703_v58 = vpop.eup %2702 }
 0xdc3   :  { %1201 = vrot.lane.b32.xlu1 %v2703_v58, %s2968_s3 }
 0xe2c   :  { %v1176_v59 = vpop.permute.xlu0 %1175 }
 0xe2d   :  { %v1178_v60 = vmul.f32 %v1176_v59, %v1161_v39 }
 0xe2f   :  { %1212 = vrot.lane.b32.xlu0 %v1178_v60, %s2969_s26 }
 0xe35   :  { %v1202_v61 = vpop.permute.xlu1 %1201 }
 0xe36   :  { %v1204_v62 = vmul.f32 %v1202_v61, %v1187_v42 }
 0xe38   :  { %1206 = vrot.lane.b32.xlu1 %v1204_v62, %s2969_s26 }
 0xea1   :  { %v1213_v63 = vpop.permute.xlu0 %1212 }
 0xea2   :  { %2266 = vmatmul.mubr.msk.f32.vlgmr.msra.gmra.mrb[8].mxu0 %vm125_vm0, %v1213_v63 }
 0xea3   :  { %2586 = vmatpush1.bf16.msra.mxu0 %v3174_v11  ;;  %1490 = vmatprep.mubr.f32.mxu0 %v2964_v0 }
 0xea4   :  { %2588 = vmatprep.subr.bf16.mxu0 %v3216_v53 }
 0xea7   :  { %2590 = vmatpush1.bf16.msra.mxu0 %v3179_v15 }
 0xea8   :  { %2598 = vmatprep.subr.bf16.mxu0 %v3212_v48 }
 0xeaa   :  { %v1207_v1 = vpop.permute.xlu1 %1206 }
 0xeab   :  { %1210 = vst.msk [vmem:[#allocation3 + $0x18] sm:$0x3] %vm579_vm5, %v1207_v1  ;;  %2433 = vmatmul.mubr.msk.f32.vlgmr.msra.gmra.mrb[12].mxu1 %vm125_vm0, %v1207_v1 }
 0xeac   :  { %2593 = vmatpush3.bf16.msra.mxu1 %v3214_v52  ;;  %2443 = vmatprep.mubr.msk.f32.mxu1 %vm2966_vm1, %v2964_v0 }
 0xead   :  { %2594 = vmatprep.subr.bf16.mxu1 %v2965_v12 }
 0xeb0   :  { %2596 = vmatpush3.bf16.msra.mxu1 %v3221_v56 }
 0xeb1   :  { %2605 = vmatprep.subr.bf16.mxu1 %v2965_v12 }
 0xf75   :  { %v1282_v2 = vpop.f32.mrb[8].mxu0 }
 0xf76   :  { %v1360_v5 = vadd.f32 %v1359_v3, %v1282_v2  ;;  %v1284_v6 = vpop.f32.mrb[9].mxu0 }
 0xf78   :  { %v1363_v7 = vmul.f32 %v1360_v5, %v3195_v27 }
 0xf7a   :  { %v2268_v8 = vmul.f32 -1.442695, %v1363_v7 }
 0xf7c   :  { %2704 = vpow2.f32 %v2268_v8 }
 0xf7e   :  { %v1355_v9 = vpop.f32.mrb[12].mxu1 }
 0xf7f   :  { %v1361_v10 = vadd.f32 %v1355_v9, %v1284_v6  ;;  %v2434_v13 = vpop.f32.mrb[13].mxu1 }
 0xf81   :  { %v1362_v14 = vadd.f32 %v3250_v4, %v1361_v10 }
 0xf83   :  { %v1389_v16 = vmul.f32 %v1362_v14, %v3195_v27 }
 0xf85   :  { %v2269_v17 = vmul.f32 -1.442695, %v1389_v16 }
 0xf86   :  { %v2705_v18 = vpop.eup %2704 }
 0xf87   :  { %v1367_v19 = vadd.f32 1.0, %v2705_v18  ;;  %2706 = vpow2.f32 %v2269_v17 }
 0xf89   :  { %2708 = vrcp.f32 %v1367_v19 }
 0xf91   :  { %v2707_v20 = vpop.eup %2706 }
 0xf92   :  { %v1393_v21 = vadd.f32 1.0, %v2707_v20 }
 0xf93   :  { %v2709_v22 = vpop.eup %2708 }
 0xf94   :  { %2710 = vrcp.f32 %v1393_v21  ;;  %v1370_v23 = vmul.f32 %v2709_v22, %v3195_v27 }
 0xf96   :  { %v1371_v24 = vadd.f32 %v1370_v23, %v3199_v35 }
 0xf98   :  { %1374 = vrot.lane.b32.xlu0 %v1371_v24, %s2968_s3  ;;  %v1372_v33 = vmul.f32 %v1371_v24, %v3378_v50 }
 0xf9e   :  { %v2711_v25 = vpop.eup %2710 }
 0xf9f   :  { %v1396_v26 = vmul.f32 %v2711_v25, %v3195_v27 }
 0xfa1   :  { %v1397_v28 = vadd.f32 %v1396_v26, %v3199_v35 }
 0xfa3   :  { %1400 = vrot.lane.b32.xlu1 %v1397_v28, %s2968_s3  ;;  %v1398_v37 = vmul.f32 %v1397_v28, %v3382_v55 }
0x100a   :  { %v1375_v29 = vpop.permute.xlu0 %1374 }
0x100b   :  { %v1377_v30 = vmul.f32 %v1375_v29, %v1371_v24 }
0x100d   :  { %1379 = vrot.lane.b32.xlu0 %v1377_v30, %s2969_s26 }
0x1015   :  { %v1401_v31 = vpop.permute.xlu1 %1400 }
0x1016   :  { %v1403_v32 = vmul.f32 %v1401_v31, %v1397_v28 }
0x1018   :  { %1405 = vrot.lane.b32.xlu1 %v1403_v32, %s2969_s26  ;;  %v1779_v32 = vld [vmem:[#allocation2 + $0xe] sm:$0x3] }
0x107f   :  { %v1380_v34 = vpop.permute.xlu0 %1379 }
0x1080   :  { %v3415_v36 = vadd.f32 %v1380_v34, %v1372_v33 }
0x1082   :  { %2712 = vtanh.f32 %v3415_v36 }
0x108a   :  { %v1406_v38 = vpop.permute.xlu1 %1405 }
0x108b   :  { %v3419_v39 = vadd.f32 %v1406_v38, %v1398_v37 }
0x108c   :  { %v2713_v40 = vpop.eup %2712 }
0x108d   :  { %2714 = vtanh.f32 %v3419_v39  ;;  %1385 = vrot.lane.b32.xlu0 %v2713_v40, %s2968_s3 }
0x1097   :  { %v2715_v41 = vpop.eup %2714 }
0x1098   :  { %1411 = vrot.lane.b32.xlu1 %v2715_v41, %s2968_s3 }
0x10ff   :  { %v1386_v42 = vpop.permute.xlu0 %1385 }
0x1100   :  { %v1388_v43 = vmul.f32 %v1386_v42, %v1371_v24 }
0x1102   :  { %1422 = vrot.lane.b32.xlu0 %v1388_v43, %s2969_s26 }
0x110a   :  { %v1412_v44 = vpop.permute.xlu1 %1411 }
0x110b   :  { %v1414_v45 = vmul.f32 %v1412_v44, %v1397_v28 }
0x110d   :  { %1416 = vrot.lane.b32.xlu1 %v1414_v45, %s2969_s26 }
0x1174   :  { %v1423_v46 = vpop.permute.xlu0 %1422 }
0x1175   :  { %2270 = vmatmul.mubr.msk.f32.vlgmr.msra.gmra.mrb[10].mxu0 %vm125_vm0, %v1423_v46 }
0x1176   :  { %2600 = vmatpush1.bf16.msra.mxu0 %v3174_v11  ;;  %1700 = vmatprep.mubr.f32.mxu0 %v2964_v0 }
0x1177   :  { %2602 = vmatprep.subr.bf16.mxu0 %v3216_v53 }
0x117a   :  { %2604 = vmatpush1.bf16.msra.mxu0 %v3179_v15  ;;  %v1569_v15 = vld [vmem:[#allocation2 + $0xc] sm:$0x3] }
0x117b   :  { %2611 = vmatprep.subr.bf16.mxu0 %v2965_v12 }
0x117f   :  { %v1417_v47 = vpop.permute.xlu1 %1416 }
0x1180   :  { %1420 = vst.msk [vmem:[#allocation3 + $0x20] sm:$0x3] %vm579_vm5, %v1417_v47  ;;  %2444 = vmatmul.mubr.msk.f32.vlgmr.msra.gmra.mrb[14].mxu1 %vm125_vm0, %v1417_v47 }
0x1181   :  { %2607 = vmatpush3.bf16.msra.mxu1 %v3214_v52  ;;  %2454 = vmatprep.mubr.msk.f32.mxu1 %vm2966_vm1, %v2964_v0 }
0x1182   :  { %2608 = vmatprep.subr.bf16.mxu1 %v2965_v12 }
0x1185   :  { %2610 = vmatpush3.bf16.msra.mxu1 %v3221_v56 }
0x1186   :  { %2617 = vmatprep.subr.bf16.mxu1 %v2965_v12 }
0x1248   :  { %v1492_v11 = vpop.f32.mrb[10].mxu0 }
0x1249   :  { %v1570_v49 = vadd.f32 %v1569_v15, %v1492_v11  ;;  %v1494_v50 = vpop.f32.mrb[11].mxu0 }
0x124b   :  { %v1573_v51 = vmul.f32 %v1570_v49, %v3195_v27 }
0x124d   :  { %v2272_v54 = vmul.f32 -1.442695, %v1573_v51 }
0x124f   :  { %2716 = vpow2.f32 %v2272_v54 }
0x1253   :  { %v1565_v55 = vpop.f32.mrb[14].mxu1 }
0x1254   :  { %v1571_v57 = vadd.f32 %v1565_v55, %v1494_v50  ;;  %v2445_v58 = vpop.f32.mrb[15].mxu1 }
0x1256   :  { %v1572_v59 = vadd.f32 %v3250_v4, %v1571_v57 }
0x1258   :  { %v1599_v60 = vmul.f32 %v1572_v59, %v3195_v27 }
0x1259   :  { %v2717_v61 = vpop.eup %2716 }
0x125a   :  { %v1577_v62 = vadd.f32 1.0, %v2717_v61  ;;  %v2273_v63 = vmul.f32 -1.442695, %v1599_v60 }
0x125c   :  { %2718 = vrcp.f32 %v1577_v62 }
0x125d   :  { %2720 = vpow2.f32 %v2273_v63  ;;  %v2043_v63 = vld [vmem:[#allocation13] sm:$0xff] }
0x1266   :  { %v2719_v1 = vpop.eup %2718 }
0x1267   :  { %v2721_v2 = vpop.eup %2720  ;;  %v1580_v3 = vmul.f32 %v2719_v1, %v3195_v27  ;;  %v2044_v1 = vld [vmem:[#allocation13 + $0x8] sm:$0xff] }
0x1268   :  { %v1603_v5 = vadd.f32 1.0, %v2721_v2  ;;  %v2623_v2 = vpack.c.bf16 %v2044_v1, %v2043_v63 }
0x1269   :  { %v1581_v6 = vadd.f32 %v1580_v3, %v3199_v35 }
0x126a   :  { %2722 = vrcp.f32 %v1603_v5 }
0x126b   :  { %1584 = vrot.lane.b32.xlu0 %v1581_v6, %s2968_s3  ;;  %v1582_v17 = vmul.f32 %v1581_v6, %v3415_v36 }
0x1274   :  { %v2723_v7 = vpop.eup %2722 }
0x1275   :  { %v1606_v8 = vmul.f32 %v2723_v7, %v3195_v27 }
0x1277   :  { %v1607_v9 = vadd.f32 %v1606_v8, %v3199_v35 }
0x1279   :  { %1610 = vrot.lane.b32.xlu1 %v1607_v9, %s2968_s3  ;;  %v1608_v21 = vmul.f32 %v1607_v9, %v3419_v39 }
0x12dd   :  { %v1585_v10 = vpop.permute.xlu0 %1584 }
0x12de   :  { %v1587_v13 = vmul.f32 %v1585_v10, %v1581_v6  ;;  %v2046_v10 = vld [vmem:[#allocation13 + $0x18] sm:$0xff] }
0x12e0   :  { %1589 = vrot.lane.b32.xlu0 %v1587_v13, %s2969_s26 }
0x12eb   :  { %v1611_v14 = vpop.permute.xlu1 %1610 }
0x12ec   :  { %v1613_v16 = vmul.f32 %v1611_v14, %v1607_v9 }
0x12ee   :  { %1615 = vrot.lane.b32.xlu1 %v1613_v16, %s2969_s26  ;;  %v2035_v16 = vld [vmem:[#allocation3] sm:$0xff] }
0x1352   :  { %v1590_v18 = vpop.permute.xlu0 %1589 }
0x1353   :  { %v3452_v19 = vadd.f32 %v1590_v18, %v1582_v17  ;;  %v2036_v17 = vld [vmem:[#allocation3 + $0x8] sm:$0xff]  ;;  %v2037_v18 = vld [vmem:[#allocation3 + $0x10] sm:$0xff] }
0x1355   :  { %2724 = vtanh.f32 %v3452_v19 }
0x135f   :  { %v2725_v20 = vpop.eup %2724 }
0x1360   :  { %v1616_v22 = vpop.permute.xlu1 %1615  ;;  %1595 = vrot.lane.b32.xlu0 %v2725_v20, %s2968_s3  ;;  %v2039_v20 = vld [vmem:[#allocation3 + $0x20] sm:$0xff] }
0x1361   :  { %v3457_v23 = vadd.f32 %v1616_v22, %v1608_v21 }
0x1363   :  { %2726 = vtanh.f32 %v3457_v23 }
0x136d   :  { %v2727_v24 = vpop.eup %2726 }
0x136e   :  { %1621 = vrot.lane.b32.xlu1 %v2727_v24, %s2968_s3 }
0x13d2   :  { %v1596_v25 = vpop.permute.xlu0 %1595 }
0x13d3   :  { %v1598_v26 = vmul.f32 %v1596_v25, %v1581_v6 }
0x13d5   :  { %1632 = vrot.lane.b32.xlu0 %v1598_v26, %s2969_s26 }
0x13e0   :  { %v1622_v28 = vpop.permute.xlu1 %1621 }
0x13e1   :  { %v1624_v29 = vmul.f32 %v1622_v28, %v1607_v9  ;;  %v2045_v9 = vld [vmem:[#allocation13 + $0x10] sm:$0xff] }
0x13e2   :  { %v2627_v13 = vpack.c.bf16 %v2046_v10, %v2045_v9 }
0x13e3   :  { %1626 = vrot.lane.b32.xlu1 %v1624_v29, %s2969_s26 }
0x1447   :  { %v1633_v30 = vpop.permute.xlu0 %1632 }
0x1448   :  { %2274 = vmatmul.mubr.msk.f32.vlgmr.msra.gmra.mrb[12].mxu0 %vm125_vm0, %v1633_v30 }
0x1449   :  { %2613 = vmatpush3.bf16.msra.mxu0 %v3214_v52  ;;  %2465 = vmatprep.mubr.msk.f32.mxu0 %vm2966_vm1, %v2964_v0 }
0x144a   :  { %2614 = vmatprep.subr.bf16.mxu0 %v2965_v12 }
0x144d   :  { %2616 = vmatpush3.bf16.msra.mxu0 %v3221_v56 }
0x144e   :  { %2624 = vmatprep.subr.bf16.mxu0 %v2623_v2 }
0x1455   :  { %v1627_v31 = vpop.permute.xlu1 %1626 }
0x1456   :  { %1630 = vst.msk [vmem:[#allocation3 + $0x28] sm:$0x3] %vm579_vm5, %v1627_v31  ;;  %2455 = vmatmul.mubr.msk.f32.vlgmr.msra.gmra.mrb[16].mxu1 %vm125_vm0, %v1627_v31  ;;  %v3515_v31 = vld [vmem:[%s3589_s8] ss:$0 sm:$0xff]  ;;  %s2970_s8 = smov 96  }
0x1457   :  { %2619 = vmatpush3.bf16.msra.mxu1 %v3212_v48  ;;  %2476 = vmatprep.mubr.msk.f32.mxu1 %vm2966_vm1, %v2964_v0 }
0x1458   :  { %2620 = vmatprep.subr.bf16.mxu1 %v2965_v12 }
0x145b   :  { %2622 = vmatpush3.bf16.msra.mxu1 %v3216_v53 }
0x145d   :  { %v2040_v21 = vld [vmem:[#allocation3 + $0x28] sm:$0xff] }
0x151b   :  { %v1702_v52 = vpop.f32.mrb[12].mxu0 }
0x151c   :  { %v1780_v33 = vadd.f32 %v1779_v32, %v1702_v52  ;;  %v1704_v34 = vpop.f32.mrb[13].mxu0 }
0x151e   :  { %v1783_v56 = vmul.f32 %v1780_v33, %v3195_v27 }
0x1520   :  { %v2276_v36 = vmul.f32 -1.442695, %v1783_v56 }
0x1522   :  { %2728 = vpow2.f32 %v2276_v36 }
0x1529   :  { %v1775_v37 = vpop.f32.mrb[16].mxu1 }
0x152a   :  { %v1781_v38 = vadd.f32 %v1775_v37, %v1704_v34  ;;  %v2456_v39 = vpop.f32.mrb[17].mxu1 }
0x152c   :  { %v2729_v40 = vpop.eup %2728  ;;  %v1782_v48 = vadd.f32 %v3250_v4, %v1781_v38 }
0x152d   :  { %v1787_v41 = vadd.f32 1.0, %v2729_v40 }
0x152e   :  { %v1809_v0 = vmul.f32 %v1782_v48, %v3195_v27 }
0x152f   :  { %2730 = vrcp.f32 %v1787_v41 }
0x1530   :  { %v2277_v12 = vmul.f32 -1.442695, %v1809_v0 }
0x1532   :  { %2732 = vpow2.f32 %v2277_v12 }
0x1539   :  { %v2731_v53 = vpop.eup %2730 }
0x153a   :  { %v1790_v42 = vmul.f32 %v2731_v53, %v3195_v27 }
0x153c   :  { %v2733_v43 = vpop.eup %2732  ;;  %v1791_v44 = vadd.f32 %v1790_v42, %v3199_v35 }
0x153d   :  { %v1813_v45 = vadd.f32 1.0, %v2733_v43 }
0x153e   :  { %1794 = vrot.lane.b32.xlu0 %v1791_v44, %s2968_s3  ;;  %v1792_v54 = vmul.f32 %v1791_v44, %v3452_v19  ;;  %v2038_v19 = vld [vmem:[#allocation3 + $0x18] sm:$0xff] }
0x153f   :  { %2734 = vrcp.f32 %v1813_v45 }
0x1549   :  { %v2735_v46 = vpop.eup %2734 }
0x154a   :  { %v1816_v47 = vmul.f32 %v2735_v46, %v3195_v27 }
0x154c   :  { %v1817_v11 = vadd.f32 %v1816_v47, %v3199_v35 }
0x154e   :  { %1820 = vrot.lane.b32.xlu1 %v1817_v11, %s2968_s3  ;;  %v1818_v59 = vmul.f32 %v1817_v11, %v3457_v23 }
0x15b0   :  { %v1795_v15 = vpop.permute.xlu0 %1794 }
0x15b1   :  { %v1797_v49 = vmul.f32 %v1795_v15, %v1791_v44 }
0x15b3   :  { %1799 = vrot.lane.b32.xlu0 %v1797_v49, %s2969_s26 }
0x15c0   :  { %v1821_v50 = vpop.permute.xlu1 %1820 }
0x15c1   :  { %v1823_v51 = vmul.f32 %v1821_v50, %v1817_v11 }
0x15c3   :  { %1825 = vrot.lane.b32.xlu1 %v1823_v51, %s2969_s26 }
0x1625   :  { %v1800_v55 = vpop.permute.xlu0 %1799 }
0x1626   :  { %v3488_v57 = vadd.f32 %v1800_v55, %v1792_v54 }
0x1628   :  { %2736 = vtanh.f32 %v3488_v57 }
0x1632   :  { %v2737_v58 = vpop.eup %2736 }
0x1633   :  { %1805 = vrot.lane.b32.xlu0 %v2737_v58, %s2968_s3 }
0x1635   :  { %v1826_v60 = vpop.permute.xlu1 %1825 }
0x1636   :  { %v3493_v61 = vadd.f32 %v1826_v60, %v1818_v59 }
0x1638   :  { %2738 = vtanh.f32 %v3493_v61 }
0x1642   :  { %v2739_v62 = vpop.eup %2738 }
0x1643   :  { %1831 = vrot.lane.b32.xlu1 %v2739_v62, %s2968_s3 }
0x16a5   :  { %v1806_v3 = vpop.permute.xlu0 %1805 }
0x16a6   :  { %v1808_v5 = vmul.f32 %v1806_v3, %v1791_v44 }
0x16a8   :  { %1914 = vrot.lane.b32.xlu1 %v1808_v5, %s2969_s26 }
0x16b5   :  { %v1832_v6 = vpop.permute.xlu1 %1831 }
0x16b6   :  { %v1834_v7 = vmul.f32 %v1832_v6, %v1817_v11 }
0x16b8   :  { %1836 = vrot.lane.b32.xlu0 %v1834_v7, %s2969_s26 }
0x171a   :  { %v1915_v8 = vpop.permute.xlu1 %1914 }
0x171b   :  { %2021 = vst.msk [vmem:[#allocation16] sm:$0x3] %vm579_vm5, %v1915_v8  ;;  %2477 = vmatmul.mubr.msk.f32.vlgmr.msra.gmra.mrb[18].mxu1 %vm125_vm0, %v1915_v8 }
0x172a   :  { %v1837_v14 = vpop.permute.xlu0 %1836 }
0x172b   :  { %1840 = vst.msk [vmem:[#allocation3 + $0x30] sm:$0x3] %vm579_vm5, %v1837_v14  ;;  %2466 = vmatmul.mubr.msk.f32.vlgmr.msra.gmra.mrb[14].mxu0 %vm125_vm0, %v1837_v14 }
0x172c   :  { %2626 = vmatpush3.bf16.msra.mxu0 %v2623_v2  ;;  %2487 = vmatprep.mubr.msk.f32.mxu0 %vm125_vm0, %v2035_v16 }
0x172d   :  { %2628 = vmatprep.subr.bf16.mxu0 %v2627_v13 }
0x1730   :  { %2630 = vmatpush3.bf16.msra.mxu0 %v2627_v13 }
0x1732   :  { %v2041_v22 = vld [vmem:[#allocation3 + $0x30] sm:$0xff] }
0x1733   :  { %2488 = vmatmul.mubr.msk.f32.vlgmr.msra.gmra.mrb[16].mxu0 %vm125_vm0, %v2036_v17 }
0x1734   :  { %2490 = vmatprep.mubr.msk.f32.mxu0 %vm125_vm0, %v2037_v18 }
0x1737   :  { %2491 = vmatmul.mubr.msk.f32.gmra.mrb[18].mxu0 %vm125_vm0, %v2038_v19 }
0x1738   :  { %2493 = vmatprep.mubr.msk.f32.mxu0 %vm125_vm0, %v2039_v20 }
0x173b   :  { %2494 = vmatmul.mubr.msk.f32.gmra.mrb[20].mxu0 %vm125_vm0, %v2040_v21 }
0x173c   :  { %2496 = vmatprep.mubr.msk.f32.mxu0 %vm125_vm0, %v2041_v22 }
0x17ee   :  { %v1984_v23 = vpop.f32.mrb[18].mxu1 }
0x17ef   :  { %v2478_v24 = vpop.f32.mrb[19].mxu1 }
0x17fe   :  { %v1909_v25 = vpop.f32.mrb[14].mxu0 }
0x17ff   :  { %v1985_v26 = vadd.f32 %v1984_v23, %v1909_v25  ;;  %v2467_v28 = vpop.f32.mrb[15].mxu0 }
0x1801   :  { %v1988_v29 = vadd.f32 %v3250_v4, %v1985_v26 }
0x1803   :  { %v1989_v30 = vmul.f32 %v1988_v29, %v3195_v27 }
0x1805   :  { %v2280_v52 = vmul.f32 -1.442695, %v1989_v30 }
0x1806   :  { %v2489_v32 = vpop.f32.mrb[16].mxu0 }
0x1807   :  { %2740 = vpow2.f32 %v2280_v52  ;;  %v2150_v33 = vadd.f32 %v2489_v32, %v3515_v31  ;;  %v2144_v34 = vpop.f32.mrb[17].mxu0 }
0x1808   :  { %v2145_v56 = vadd.f32 %v3515_v31, %v2144_v34 }
0x1809   :  { %2184 = vst [vmem:[#allocation15 + $0x8] sm:$0xff] %v2150_v33 }
0x180a   :  { %2183 = vst [vmem:[#allocation15] sm:$0xff] %v2145_v56  ;;  %v2492_v36 = vpop.f32.mrb[18].mxu0 }
0x180b   :  { %v2160_v4 = vadd.f32 %v2492_v36, %v3515_v31  ;;  %v2154_v37 = vpop.f32.mrb[19].mxu0 }
0x180c   :  { %v2155_v38 = vadd.f32 %v3515_v31, %v2154_v37 }
0x180d   :  { %2186 = vst [vmem:[#allocation15 + $0x18] sm:$0xff] %v2160_v4 }
0x180e   :  { %2185 = vst [vmem:[#allocation15 + $0x10] sm:$0xff] %v2155_v38  ;;  %v2495_v39 = vpop.f32.mrb[20].mxu0 }
0x180f   :  { %v2170_v40 = vadd.f32 %v2495_v39, %v3515_v31  ;;  %v2164_v48 = vpop.f32.mrb[21].mxu0 }
0x1810   :  { %v2165_v41 = vadd.f32 %v3515_v31, %v2164_v48 }
0x1811   :  { %v2741_v0 = vpop.eup %2740  ;;  %2188 = vst [vmem:[#allocation15 + $0x28] sm:$0xff] %v2170_v40 }
0x1812   :  { %v1993_v12 = vadd.f32 1.0, %v2741_v0  ;;  %2187 = vst [vmem:[#allocation15 + $0x20] sm:$0xff] %v2165_v41 }
0x1814   :  { %2742 = vrcp.f32 %v1993_v12 }
0x181e   :  { %v2743_v53 = vpop.eup %2742 }
0x181f   :  { %v1996_v42 = vmul.f32 %v2743_v53, %v3195_v27 }
0x1821   :  { %v1997_v43 = vadd.f32 %v1996_v42, %v3199_v35 }
0x1823   :  { %2000 = vrot.lane.b32.xlu0 %v1997_v43, %s2968_s3  ;;  %v1998_v46 = vmul.f32 %v1997_v43, %v3493_v61 }
0x1895   :  { %v2001_v44 = vpop.permute.xlu0 %2000 }
0x1896   :  { %v2003_v45 = vmul.f32 %v2001_v44, %v1997_v43 }
0x1898   :  { %2005 = vrot.lane.b32.xlu1 %v2003_v45, %s2969_s26 }
0x190a   :  { %v2006_v47 = vpop.permute.xlu1 %2005 }
0x190b   :  { %v2008_v11 = vadd.f32 %v2006_v47, %v1998_v46 }
0x190d   :  { %2744 = vtanh.f32 %v2008_v11 }
0x1917   :  { %v2745_v15 = vpop.eup %2744 }
0x1918   :  { %2011 = vrot.lane.b32.xlu0 %v2745_v15, %s2968_s3 }
0x191c   :  { %2025 = vrot.lane.b32.xlu0 %v3488_v57, %s2970_s8 }
0x198a   :  { %v2012_v27 = vpop.permute.xlu0 %2011 }
0x198b   :  { %v2014_v49 = vmul.f32 %v2012_v27, %v1997_v43 }
0x198d   :  { %2016 = vrot.lane.b32.xlu1 %v2014_v49, %s2969_s26 }
0x198e   :  { %v2026_v35 = vpop.permute.xlu0 %2025 }
0x198f   :  { %2028 = vst.msk [vmem:[#allocation18] sm:$0x3] %vm579_vm5, %v2026_v35 }
0x1991   :  { %2030 = vrot.lane.b32.xlu1 %v2008_v11, %s2970_s8 }
0x19ff   :  { %v2017_v50 = vpop.permute.xlu1 %2016 }
0x1a00   :  { %2019 = vst.msk [vmem:[#allocation3 + $0x38] sm:$0x3] %vm579_vm5, %v2017_v50  ;;  %2023 = vst.msk [vmem:[#allocation16 + $0x2] sm:$0x3] %vm579_vm5, %v2017_v50 }
0x1a03   :  { %v2031_v51 = vpop.permute.xlu1 %2030 }
0x1a04   :  { %2034 = vst.msk [vmem:[#allocation18 + $0x2] sm:$0x3] %vm579_vm5, %v2031_v51 }
0x1a07   :  { %v2042_v54 = vld [vmem:[#allocation3 + $0x38] sm:$0xff] }
0x1a08   :  { %2497 = vmatmul.mubr.msk.f32.gmra.mrb[22].mxu0 %vm125_vm0, %v2042_v54 }
0x1a09   :  { %2889 = shalt.err (!%p2886_p10)
}
0x1a0a   :  { %s2890_s30 = scalar_lea.hbm %s3593_s12, 64 }
0x1a0b   :  { %p2891_p11 = scmp.ne.s32.totalorder %s3593_s12, %s2890_s30  ;;  %p2894_p12 = scmp.lt.u32.totalorder %s2890_s30, %s3593_s12 }
0x1a0d   :  { %p2896_p13 = pnand %p2894_p12, %p2891_p11 }
0x1a0f   :  { %2899 = shalt.err (!%p2896_p13)
}
0x1a10   :  { %s2972_s14 = smov 2   ;;  %s2973_s3 = smov [#allocation18]  }
0x1a11   :  { %2214 = dma.vmem_to_hbm [thread:$0]  %s2209_s25, 64, %s3593_s12, [#allocation17], %s2969_s26, %s2969_s26, %s2972_s14  }
0x1a12   :  { %s2220_s16 = sshll.u32 %s2973_s3, 4  ;;  %s2221_s16 = int_to_ptr.vmem [resolvable:$true] %s2220_s16 }
0x1a13   :  { %s2900_s1 = scalar_lea.vmem %s2221_s16, 64  ;;  %p2905_p1 = scmp.lt.s32.totalorder %s2221_s16, %s2221_s16 }
0x1a14   :  { %p2901_p0 = scmp.ne.s32.totalorder %s2221_s16, %s2900_s1  ;;  %p2906_p2 = scmp.lt.s32.totalorder %s2900_s1, %s2900_s1 }
0x1a16   :  { %p2907_p3 = por %p2906_p2, %p2905_p1 }
0x1a18   :  { %p2908_p4 = pnand %p2907_p3, %p2901_p0 }
0x1a1a   :  { %2911 = shalt.err (!%p2908_p4)
}
0x1a1b   :  { %s2912_s9 = scalar_lea.hbm %s3594_s13, 64 }
0x1a1c   :  { %p2913_p5 = scmp.ne.s32.totalorder %s3594_s13, %s2912_s9  ;;  %p2916_p6 = scmp.lt.u32.totalorder %s2912_s9, %s3594_s13 }
0x1a1e   :  { %p2918_p7 = pnand %p2916_p6, %p2913_p5 }
0x1a20   :  { %2921 = shalt.err (!%p2918_p7)
}
0x1a21   :  { %2226 = dma.vmem_to_hbm [thread:$0]  %s2221_s16, 64, %s3594_s13, [#allocation17], %s2969_s26, %s2969_s26, %s2972_s14  }
0x1a22   :  { %s2974_s8 = smov [#allocation15]  }
0x1a23   :  { %s2196_s24 = sshll.u32 %s2974_s8, 4  ;;  %s2197_s24 = int_to_ptr.vmem [resolvable:$true] %s2196_s24 }
0x1a24   :  { %s2922_s25 = scalar_lea.vmem %s2197_s24, 1024  ;;  %p2927_p9 = scmp.lt.s32.totalorder %s2197_s24, %s2197_s24 }
0x1a25   :  { %p2923_p8 = scmp.ne.s32.totalorder %s2197_s24, %s2922_s25  ;;  %p2928_p10 = scmp.lt.s32.totalorder %s2922_s25, %s2922_s25 }
0x1a27   :  { %p2929_p11 = por %p2928_p10, %p2927_p9 }
0x1a29   :  { %p2930_p12 = pnand %p2929_p11, %p2923_p8 }
0x1adb   :  { %v2498_v55 = vpop.f32.mrb[22].mxu0 }
0x1adc   :  { %v2180_v57 = vadd.f32 %v2498_v55, %v3515_v31  ;;  %v2174_v58 = vpop.f32.mrb[23].mxu0 }
0x1add   :  { %v2175_v59 = vadd.f32 %v3515_v31, %v2174_v58 }
0x1ade   :  { %2190 = vst [vmem:[#allocation15 + $0x38] sm:$0xff] %v2180_v57 }
0x1adf   :  { %2189 = vst [vmem:[#allocation15 + $0x30] sm:$0xff] %v2175_v59 }
0x1ae0   :  { %2933 = shalt.err (!%p2930_p12)
}
0x1ae1   :  { %s2934_s26 = scalar_lea.hbm %s3592_s11, 1024 }
0x1ae2   :  { %p2935_p13 = scmp.ne.s32.totalorder %s3592_s11, %s2934_s26  ;;  %p2938_p0 = scmp.lt.u32.totalorder %s2934_s26, %s3592_s11 }
0x1ae4   :  { %p2940_p1 = pnand %p2938_p0, %p2935_p13 }
0x1ae6   :  { %2943 = shalt.err (!%p2940_p1)
}
0x1ae7   :  { %2202 = dma.vmem_to_hbm [thread:$0]  %s2197_s24, 1024, %s3592_s11, [#allocation6], %s2958_s20, %s2958_s20, %s2959_s21  }
0x1ae8   :  { %2952 = dma.done.wait [#allocation6], 1024  }
0x1ae9   :  { %2953 = vsyncadd [#allocation6], 4294966272 }
0x1aea   :  { %2954 = dma.done.wait [#allocation17], 128  }
0x1aeb   :  { %2955 = vsyncadd [#allocation17], 4294967168 }
0x1aec   :  { %2236 = vsyncpa [#allocation5], 1 }
0x1aed   :  { %2237 = vsyncpa [#allocation8], 1 }
0x1aee   :  { %2238 = vsyncpa [#allocation11], 1 }
0x1aef   :  { %2239 = vsyncpa [#allocation14], 1 }
0x1af0   :  { %2240 = vsyncpa [#allocation6], 1 }
0x1af1   :  { %2241 = vsyncpa [#allocation17], 1 }

</bundles_post_ra>
